<compile_context>
chip_gen: v7x
topology: tpu7x:2x2x1
jax: 0.10.0
libtpu: 0.0.40
codegen_flags: <defaults>
</compile_context>

<pallas_src>
import numpy as np

import jax
import jax.numpy as jnp
from jax.experimental import pallas as pl
from jax.experimental.pallas import tpu as pltpu

EPS = 1e-5  # BatchNorm eps (PyTorch default)


# ----------------------------------------------------------------------------
# Pallas kernel: whole network, single invocation, everything in VMEM.
# ----------------------------------------------------------------------------
def _cnn_kernel(x_ref, a1_ref, t1_ref, a2_ref, t2_ref, wfc_ref, tfc_ref, o_ref):
    def conv_block(h, a_ref, t_ref):
        # Conv1d + BN(eval) + ReLU + MaxPool1d(3,2), channel-last:
        #   one MXU matmul against [A_0 | A_1 | A_2], then a lane-aligned
        #   3-slab max, a single shift add and a single ReLU (all VPU).
        slab = t_ref.shape[1]                               # multiple of 128
        z = jnp.dot(h.astype(jnp.bfloat16), a_ref[...],
                    preferred_element_type=jnp.float32)     # (B, 3*slab) f32
        m = jnp.maximum(jnp.maximum(z[:, :slab], z[:, slab:2 * slab]),
                        z[:, 2 * slab:])
        return jnp.maximum(m + t_ref[...], 0.0)

    h = conv_block(x_ref[...], a1_ref, t1_ref)              # (B, slab1)
    h = conv_block(h, a2_ref, t2_ref)                       # (B, slab2)
    # Entire FC stack (6 affine layers) folded at init into one affine map.
    out = jnp.dot(h.astype(jnp.bfloat16), wfc_ref[...],
                  preferred_element_type=jnp.float32) + tfc_ref[...]
    o_ref[...] = out.astype(o_ref.dtype)


def cnn_forward(fused, x):
    """x: (B, input_size) f32 -> (B, 1) f32, matching CNN.forward (eval mode)."""
    args = [x, fused["a1"], fused["t1"], fused["a2"], fused["t2"],
            fused["w_fc"], fused["t_fc"]]
    return pl.pallas_call(
        _cnn_kernel,
        out_shape=jax.ShapeDtypeStruct((x.shape[0], 1), jnp.float32),
        in_specs=[pl.BlockSpec(memory_space=pltpu.MemorySpace.VMEM)] * len(args),
        out_specs=pl.BlockSpec(memory_space=pltpu.MemorySpace.VMEM),
    )(*args)


# ----------------------------------------------------------------------------
# Init-time folding (host side, runs once, in float64 for exact composition).
# ----------------------------------------------------------------------------
def _round_up(n, m=128):
    return ((n + m - 1) // m) * m


def _conv_sizes(L_in, k=3, pad=1, stride=2, pool_k=3, pool_s=2):
    L_conv = (L_in + 2 * pad - k) // stride + 1
    L_pool = (L_conv - pool_k) // pool_s + 1
    return L_conv, L_pool


def _fold_conv_block(w, bias, gamma, beta, mean, var, L_in, in_rows):
    """Fold Conv1d(k=3,p=1,s=2) + BN(eval) + pool-tap selection into matrices.

    Input rows / output lanes are channel-last (pos*C + chan).  Returns
    A_cat (in_rows, 3*slab) bf16 (one zero-padded, 128-aligned slab per pool
    tap), shift (1, slab) f32, Lp, slab.
    """
    w, bias = np.asarray(w, np.float64), np.asarray(bias, np.float64)
    gamma, beta = np.asarray(gamma, np.float64), np.asarray(beta, np.float64)
    mean, var = np.asarray(mean, np.float64), np.asarray(var, np.float64)
    C_out, C_in, K = w.shape
    _, Lp = _conv_sizes(L_in)
    s = gamma / np.sqrt(var + EPS)
    t = (bias - mean) * s + beta
    wf = w * s[:, None, None]                       # BN scale folded into weights
    slab = _round_up(Lp * C_out)                    # lane-aligned pool-tap slab
    A = np.zeros((3, in_rows, slab), np.float64)
    for j in range(3):                              # pool tap
        for n in range(Lp):                         # pooled output position
            l = 2 * n + j                           # conv output position
            for k in range(K):
                i = 2 * l + k - 1                   # conv input position (pad=1)
                if 0 <= i < L_in:
                    A[j, i * C_in:(i + 1) * C_in,
                         n * C_out:(n + 1) * C_out] = wf[:, :, k].T
    a_cat = np.concatenate([A[0], A[1], A[2]], axis=1)       # (in_rows, 3*slab)
    shift = np.zeros((1, slab), np.float32)
    shift[0, :Lp * C_out] = np.tile(t, Lp).astype(np.float32)
    return (jnp.asarray(a_cat, dtype=jnp.bfloat16),
            jnp.asarray(shift), Lp, slab)


def _fold_fc_stack(fc_layers, perm, in_rows):
    """Compose the whole Linear+BN(eval) chain (no nonlinearity) into one
    affine map: W_total (in_rows, 1) bf16 (zero rows for padded lanes) and
    t_total (1, 1) f32."""
    W, t = None, None
    for li, layer in enumerate(fc_layers):
        w = np.asarray(layer["w"], np.float64)      # torch layout (dout, din)
        b = np.asarray(layer["b"], np.float64)
        if li == 0:
            w = w[:, perm]                          # match channel-last flatten order
        Wi, ti = w.T, b
        if layer["bn"]:
            gamma = np.asarray(layer["gamma"], np.float64)
            beta = np.asarray(layer["beta"], np.float64)
            mean = np.asarray(layer["mean"], np.float64)
            var = np.asarray(layer["var"], np.float64)
            s = gamma / np.sqrt(var + EPS)
            Wi = Wi * s[None, :]
            ti = (b - mean) * s + beta
        if W is None:
            W, t = Wi, ti
        else:
            W, t = W @ Wi, t @ Wi + ti
    Wp = np.zeros((in_rows, W.shape[1]), np.float64)
    Wp[:W.shape[0], :] = W                          # zero rows under padded lanes
    return (jnp.asarray(Wp, dtype=jnp.bfloat16),
            jnp.asarray(t[None, :].astype(np.float32)))


def init_raw_params(key, input_size):
    """Random parameters in torch layout (for both the kernel folding and the reference)."""
    ks = iter(jax.random.split(key, 64))
    raw = {"conv": [], "fc": []}
    L = input_size
    for c_in, c_out in [(1, 16), (16, 64)]:
        raw["conv"].append(dict(
            w=0.1 * jax.random.normal(next(ks), (c_out, c_in, 3), jnp.float32),
            b=0.05 * jax.random.normal(next(ks), (c_out,), jnp.float32),
            gamma=1.0 + 0.05 * jax.random.normal(next(ks), (c_out,), jnp.float32),
            beta=0.05 * jax.random.normal(next(ks), (c_out,), jnp.float32),
            mean=0.05 * jax.random.normal(next(ks), (c_out,), jnp.float32),
            var=1.0 + jnp.abs(0.05 * jax.random.normal(next(ks), (c_out,), jnp.float32)),
        ))
        _, L = _conv_sizes(L)
    feat = 64 * L                                            # C2 * Lp2 (torch flatten size)
    dims = [(feat, 512), (512, 256), (256, 128), (128, 64), (64, 32), (32, 1)]
    has_bn = [True, True, True, True, True, False]
    for (din, dout), bn in zip(dims, has_bn):
        layer = dict(
            w=(1.0 / np.sqrt(din)) * jax.random.normal(next(ks), (dout, din), jnp.float32),
            b=0.05 * jax.random.normal(next(ks), (dout,), jnp.float32),
            bn=bn)
        if bn:
            layer.update(
                gamma=1.0 + 0.05 * jax.random.normal(next(ks), (dout,), jnp.float32),
                beta=0.05 * jax.random.normal(next(ks), (dout,), jnp.float32),
                mean=0.05 * jax.random.normal(next(ks), (dout,), jnp.float32),
                var=1.0 + jnp.abs(0.05 * jax.random.normal(next(ks), (dout,), jnp.float32)))
        raw["fc"].append(layer)
    return raw


def build_fused(raw, input_size):
    """Fold raw torch-layout params into the matrices the fused kernel consumes."""
    L = input_size
    in_rows = L * 1                                          # channel-last rows of x
    conv_fused = []
    for layer in raw["conv"]:
        a_cat, shift, L, slab = _fold_conv_block(
            layer["w"], layer["b"], layer["gamma"], layer["beta"],
            layer["mean"], layer["var"], L, in_rows)
        conv_fused.append((a_cat, shift))
        in_rows = slab                                       # next block reads padded lanes
    Lp2 = L
    C2 = raw["conv"][-1]["w"].shape[0]
    # channel-last feature f = n*C2 + c  <->  torch flatten feature c*Lp2 + n
    perm = (np.arange(C2)[None, :] * Lp2 + np.arange(Lp2)[:, None]).reshape(-1)
    w_fc, t_fc = _fold_fc_stack(raw["fc"], perm, in_rows)
    return {"a1": conv_fused[0][0], "t1": conv_fused[0][1],
            "a2": conv_fused[1][0], "t2": conv_fused[1][1],
            "w_fc": w_fc, "t_fc": t_fc}


# ----------------------------------------------------------------------------
# Pure-JAX reference (torch layout / torch op order) for a correctness check.
# ----------------------------------------------------------------------------
def reference_forward(raw, x):
    h = x[:, None, :]                                        # unsqueeze(1): (B, 1, L)
    for layer in raw["conv"]:
        w, b = layer["w"], layer["b"]
        _, _, L = h.shape
        hp = jnp.pad(h, ((0, 0), (0, 0), (1, 1)))
        L_conv, Lp = _conv_sizes(L)
        idx = jnp.arange(L_conv)[:, None] * 2 + jnp.arange(3)[None, :]
        cols = hp[:, :, idx]                                 # (B, C_in, L_conv, 3)
        y = jnp.einsum("bclk,ock->bol", cols, w) + b[None, :, None]
        y = ((y - layer["mean"][None, :, None])
             * jax.lax.rsqrt(layer["var"][None, :, None] + EPS)
             * layer["gamma"][None, :, None] + layer["beta"][None, :, None])
        y = jnp.maximum(y, 0.0)
        pidx = jnp.arange(Lp)[:, None] * 2 + jnp.arange(3)[None, :]
        h = jnp.max(y[:, :, pidx], axis=-1)                  # (B, C_out, Lp)
    h = h.reshape(h.shape[0], -1)                            # x.view(B, -1)
    for layer in raw["fc"]:
        h = h @ layer["w"].T + layer["b"][None, :]
        if layer["bn"]:
            h = ((h - layer["mean"]) * jax.lax.rsqrt(layer["var"] + EPS)
                 * layer["gamma"] + layer["beta"])
    return h


# ----------------------------------------------------------------------------
if __name__ == "__main__":
    INPUT_SIZE = 128   # conv stack: (B,1,128) -> (B,16,31) -> (B,64,7) -> 448 features
    BATCH = 8          # f32 activations: >= 8 rows keeps sublanes full

    key = jax.random.PRNGKey(0)
    kp, kx = jax.random.split(key)
    raw = init_raw_params(kp, INPUT_SIZE)
    fused = build_fused(raw, INPUT_SIZE)
    x = jax.random.normal(kx, (BATCH, INPUT_SIZE), jnp.float32)

    out = jax.block_until_ready(cnn_forward(fused, x))

    with jax.default_matmul_precision("highest"):
        ref = jax.block_until_ready(reference_forward(raw, x))

    assert out.shape == (BATCH, 1), out.shape
    assert bool(jnp.all(jnp.isfinite(out)))
    assert bool(jnp.allclose(out, ref, rtol=2e-2, atol=2e-2)), (out, ref)
    print("KERNEL_OK")
</pallas_src>

<mosaic_0001>
module attributes {stable_mosaic.version = 11 : i64} {
  func.func @_cnn_kernel(%arg0: memref<8x128xf32, #tpu.memory_space<vmem>>, %arg1: memref<128x1536xbf16, #tpu.memory_space<vmem>>, %arg2: memref<1x512xf32, #tpu.memory_space<vmem>>, %arg3: memref<512x1536xbf16, #tpu.memory_space<vmem>>, %arg4: memref<1x512xf32, #tpu.memory_space<vmem>>, %arg5: memref<512x1xbf16, #tpu.memory_space<vmem>>, %arg6: memref<1x1xf32, #tpu.memory_space<vmem>>, %arg7: memref<8x1xf32, #tpu.memory_space<vmem>>) attributes {dimension_semantics = [], scalar_prefetch = 0 : i64, scratch_operands = 0 : i64, tpu.core_type = #tpu.core_type<tc>} {
    %c0 = arith.constant 0 : index
    %c0_0 = arith.constant 0 : index
    %0 = vector.load %arg0[%c0, %c0_0] : memref<8x128xf32, #tpu.memory_space<vmem>>, vector<8x128xf32>
    %1 = arith.truncf %0 : vector<8x128xf32> to vector<8x128xbf16>
    %c0_1 = arith.constant 0 : index
    %c0_2 = arith.constant 0 : index
    %2 = vector.load %arg1[%c0_1, %c0_2] : memref<128x1536xbf16, #tpu.memory_space<vmem>>, vector<128x1536xbf16>
    %cst = arith.constant dense<0.000000e+00> : vector<8x1536xf32>
    %3 = tpu.matmul %1, %2, %cst {dimension_numbers = #tpu.dot_dimension_numbers<[1], [0], [0], [1], [0, 0, 1, 1], [], []>} : vector<8x128xbf16>, vector<128x1536xbf16>, vector<8x1536xf32> -> vector<8x1536xf32>
    %4 = vector.extract_strided_slice %3 {offsets = [0, 0], sizes = [8, 512], strides = [1, 1]} : vector<8x1536xf32> to vector<8x512xf32>
    %5 = vector.extract_strided_slice %3 {offsets = [0, 512], sizes = [8, 512], strides = [1, 1]} : vector<8x1536xf32> to vector<8x512xf32>
    %6 = arith.maximumf %4, %5 : vector<8x512xf32>
    %7 = vector.extract_strided_slice %3 {offsets = [0, 1024], sizes = [8, 512], strides = [1, 1]} : vector<8x1536xf32> to vector<8x512xf32>
    %8 = arith.maximumf %6, %7 : vector<8x512xf32>
    %c0_3 = arith.constant 0 : index
    %c0_4 = arith.constant 0 : index
    %9 = vector.load %arg2[%c0_3, %c0_4] : memref<1x512xf32, #tpu.memory_space<vmem>>, vector<1x512xf32>
    %10 = vector.broadcast %9 : vector<1x512xf32> to vector<8x512xf32>
    %11 = arith.addf %8, %10 : vector<8x512xf32>
    %cst_5 = arith.constant 0.000000e+00 : f32
    %12 = vector.broadcast %cst_5 : f32 to vector<8x512xf32>
    %13 = arith.maximumf %11, %12 : vector<8x512xf32>
    %14 = arith.truncf %13 : vector<8x512xf32> to vector<8x512xbf16>
    %c0_6 = arith.constant 0 : index
    %c0_7 = arith.constant 0 : index
    %15 = vector.load %arg3[%c0_6, %c0_7] : memref<512x1536xbf16, #tpu.memory_space<vmem>>, vector<512x1536xbf16>
    %cst_8 = arith.constant dense<0.000000e+00> : vector<8x1536xf32>
    %16 = tpu.matmul %14, %15, %cst_8 {dimension_numbers = #tpu.dot_dimension_numbers<[1], [0], [0], [1], [0, 0, 1, 1], [], []>} : vector<8x512xbf16>, vector<512x1536xbf16>, vector<8x1536xf32> -> vector<8x1536xf32>
    %17 = vector.extract_strided_slice %16 {offsets = [0, 0], sizes = [8, 512], strides = [1, 1]} : vector<8x1536xf32> to vector<8x512xf32>
    %18 = vector.extract_strided_slice %16 {offsets = [0, 512], sizes = [8, 512], strides = [1, 1]} : vector<8x1536xf32> to vector<8x512xf32>
    %19 = arith.maximumf %17, %18 : vector<8x512xf32>
    %20 = vector.extract_strided_slice %16 {offsets = [0, 1024], sizes = [8, 512], strides = [1, 1]} : vector<8x1536xf32> to vector<8x512xf32>
    %21 = arith.maximumf %19, %20 : vector<8x512xf32>
    %c0_9 = arith.constant 0 : index
    %c0_10 = arith.constant 0 : index
    %22 = vector.load %arg4[%c0_9, %c0_10] : memref<1x512xf32, #tpu.memory_space<vmem>>, vector<1x512xf32>
    %23 = vector.broadcast %22 : vector<1x512xf32> to vector<8x512xf32>
    %24 = arith.addf %21, %23 : vector<8x512xf32>
    %cst_11 = arith.constant 0.000000e+00 : f32
    %25 = vector.broadcast %cst_11 : f32 to vector<8x512xf32>
    %26 = arith.maximumf %24, %25 : vector<8x512xf32>
    %27 = arith.truncf %26 : vector<8x512xf32> to vector<8x512xbf16>
    %c0_12 = arith.constant 0 : index
    %c0_13 = arith.constant 0 : index
    %28 = vector.load %arg5[%c0_12, %c0_13] : memref<512x1xbf16, #tpu.memory_space<vmem>>, vector<512x1xbf16>
    %cst_14 = arith.constant dense<0.000000e+00> : vector<8x1xf32>
    %29 = tpu.matmul %27, %28, %cst_14 {dimension_numbers = #tpu.dot_dimension_numbers<[1], [0], [0], [1], [0, 0, 1, 1], [], []>} : vector<8x512xbf16>, vector<512x1xbf16>, vector<8x1xf32> -> vector<8x1xf32>
    %c0_15 = arith.constant 0 : index
    %c0_16 = arith.constant 0 : index
    %30 = vector.load %arg6[%c0_15, %c0_16] : memref<1x1xf32, #tpu.memory_space<vmem>>, vector<1x1xf32>
    %31 = vector.broadcast %30 : vector<1x1xf32> to vector<8x1xf32>
    %32 = arith.addf %29, %31 : vector<8x1xf32>
    %c0_17 = arith.constant 0 : index
    %c0_18 = arith.constant 0 : index
    %33 = vector.load %arg7[%c0_17, %c0_18] : memref<8x1xf32, #tpu.memory_space<vmem>>, vector<8x1xf32>
    tpu.vector_store %arg7[%c0_17, %c0_18], %32 {strides = array<i32>} : memref<8x1xf32, #tpu.memory_space<vmem>>, vector<8x1xf32>,
    return
  }
}

</mosaic_0001>

<bundles_post_ra>
// kernel: tpu_custom_call.1
= control target key start
LH: loop header
LB: loop body
LE: loop exit
PB: predicated region body
PF: predicated region fallthrough
CT: control target
= control target key end

     0   :  { %s5897_s0 = inlined_call_operand.hbm [shape: f32[8,128], index: 0, kind: input, shape index: {}]   ;;  %s5898_s1 = inlined_call_operand.hbm [shape: bf16[128,1536], index: 1, kind: input, shape index: {}]   ;;  %s5899_s2 = inlined_call_operand.hbm [shape: f32[1,512], index: 2, kind: input, shape index: {}]   ;;  %s5900_s3 = inlined_call_operand.hbm [shape: bf16[512,1536], index: 3, kind: input, shape index: {}]   ;;  %s5901_s4 = inlined_call_operand.hbm [shape: f32[1,512], index: 4, kind: input, shape index: {}]   ;;  %s5902_s5 = inlined_call_operand.vmem [shape: bf16[512,1], index: 5, kind: input, shape index: {}]   ;;  %s5903_s6 = inlined_call_operand.<no memory space> [shape: f32[1,1], index: 6, kind: input, shape index: {}]   ;;  %s5904_s7 = inlined_call_operand.vmem [shape: f32[8,1], index: 7, kind: output, shape index: {}]  }
   0x1   :  { %v12_v0 = vstv %s5903_s6 }
   0x2   :  { %13 = vst [vmem:[#allocation2] sm:$0x1] %v12_v0 }
   0x3   :  { %14 = vsyncpa [#allocation4], 0 }
   0x4   :  { %15 = vsyncpa [#allocation6], 0 }
   0x5   :  { %16 = vsyncpa [#allocation9], 0  ;;  %s5604_s26 = smov [#allocation5]   ;;  %s5488_s30 = scalar_lea.hbm %s5898_s1, 12288 }
   0x6   :  { %s32_s27 = sshll.u32 %s5604_s26, 4  ;;  %p5489_p0 = scmp.ne.s32.totalorder %s5898_s1, %s5488_s30  ;;  %s33_s27 = int_to_ptr.vmem [resolvable:$true] %s32_s27 }
   0x7   :  { %p5492_p1 = scmp.lt.u32.totalorder %s5488_s30, %s5898_s1 }
   0x9   :  { %p5494_p2 = pnand %p5492_p1, %p5489_p0 }
   0xb   :  { %5497 = shalt.err (!%p5494_p2)
}
   0xc   :  { %s5498_s6 = scalar_lea.vmem %s33_s27, 12288  ;;  %p5503_p4 = scmp.lt.s32.totalorder %s33_s27, %s33_s27 }
   0xd   :  { %p5499_p3 = scmp.ne.s32.totalorder %s33_s27, %s5498_s6  ;;  %p5504_p5 = scmp.lt.s32.totalorder %s5498_s6, %s5498_s6 }
   0xf   :  { %p5505_p6 = por %p5504_p5, %p5503_p4 }
  0x11   :  { %p5506_p7 = pnand %p5505_p6, %p5499_p3 }
  0x13   :  { %5509 = shalt.err (!%p5506_p7)
}
  0x14   :  { %s5605_s12 = smov 768   ;;  %s5606_s13 = smov 48  }
  0x15   :  { %38 = dma.hbm_to_vmem [thread:$0]  %s5898_s1, 12288, %s33_s27, [#allocation6], %s5605_s12, %s5605_s12, %s5606_s13  }
  0x16   :  { %s5607_s16 = smov [#allocation8]   ;;  %s5608_s18 = smov [#allocation3]  }
  0x17   :  { %s54_s17 = sshll.u32 %s5607_s16, 4  ;;  %s23_s19 = sshll.u32 %s5608_s18, 4  ;;  %s55_s17 = int_to_ptr.vmem [resolvable:$true] %s54_s17  ;;  %s24_s19 = int_to_ptr.vmem [resolvable:$true] %s23_s19 }
  0x18   :  { %s5510_s22 = scalar_lea.hbm %s5900_s3, 49152 }
  0x19   :  { %p5511_p8 = scmp.ne.s32.totalorder %s5900_s3, %s5510_s22  ;;  %p5514_p9 = scmp.lt.u32.totalorder %s5510_s22, %s5900_s3 }
  0x1b   :  { %p5516_p10 = pnand %p5514_p9, %p5511_p8 }
  0x1d   :  { %5519 = shalt.err (!%p5516_p10)
}
  0x1e   :  { %s5520_s1 = scalar_lea.vmem %s55_s17, 49152  ;;  %p5525_p12 = scmp.lt.s32.totalorder %s55_s17, %s55_s17 }
  0x1f   :  { %p5521_p11 = scmp.ne.s32.totalorder %s55_s17, %s5520_s1  ;;  %p5526_p13 = scmp.lt.s32.totalorder %s5520_s1, %s5520_s1 }
  0x21   :  { %p5527_p0 = por %p5526_p13, %p5525_p12 }
  0x23   :  { %p5528_p1 = pnand %p5527_p0, %p5521_p11 }
  0x25   :  { %5531 = shalt.err (!%p5528_p1)
}
  0x26   :  { %60 = dma.hbm_to_vmem [thread:$0]  %s5900_s3, 49152, %s55_s17, [#allocation9], %s5605_s12, %s5605_s12, %s5606_s13  }
  0x27   :  { %s5532_s8 = scalar_lea.hbm %s5897_s0, 128 }
  0x28   :  { %p5533_p2 = scmp.ne.s32.totalorder %s5897_s0, %s5532_s8  ;;  %p5536_p3 = scmp.lt.u32.totalorder %s5532_s8, %s5897_s0 }
  0x2a   :  { %p5538_p4 = pnand %p5536_p3, %p5533_p2 }
  0x2c   :  { %5541 = shalt.err (!%p5538_p4)
}
  0x2d   :  { %s5542_s14 = scalar_lea.vmem %s24_s19, 128  ;;  %p5547_p6 = scmp.lt.s32.totalorder %s24_s19, %s24_s19 }
  0x2e   :  { %p5543_p5 = scmp.ne.s32.totalorder %s24_s19, %s5542_s14  ;;  %p5548_p7 = scmp.lt.s32.totalorder %s5542_s14, %s5542_s14 }
  0x30   :  { %p5549_p8 = por %p5548_p7, %p5547_p6 }
  0x32   :  { %p5550_p9 = pnand %p5549_p8, %p5543_p5 }
  0x34   :  { %5553 = shalt.err (!%p5550_p9)
}
  0x35   :  { %26 = dma.hbm_to_vmem [thread:$0]  %s5897_s0, 128, %s24_s19, [#allocation4]  }
  0x36   :  { %s5609_s13 = smov [#allocation7]   ;;  %s5610_s16 = smov [#allocation10]  }
  0x37   :  { %s45_s15 = sshll.u32 %s5609_s13, 4  ;;  %s67_s17 = sshll.u32 %s5610_s16, 4  ;;  %s46_s15 = int_to_ptr.vmem [resolvable:$true] %s45_s15  ;;  %s68_s17 = int_to_ptr.vmem [resolvable:$true] %s67_s17 }
  0x38   :  { %s5554_s21 = scalar_lea.hbm %s5899_s2, 64 }
  0x39   :  { %p5555_p10 = scmp.ne.s32.totalorder %s5899_s2, %s5554_s21  ;;  %p5558_p11 = scmp.lt.u32.totalorder %s5554_s21, %s5899_s2 }
  0x3b   :  { %p5560_p12 = pnand %p5558_p11, %p5555_p10 }
  0x3d   :  { %5563 = shalt.err (!%p5560_p12)
}
  0x3e   :  { %s5564_s0 = scalar_lea.vmem %s46_s15, 64  ;;  %p5569_p0 = scmp.lt.s32.totalorder %s46_s15, %s46_s15 }
  0x3f   :  { %p5565_p13 = scmp.ne.s32.totalorder %s46_s15, %s5564_s0  ;;  %p5570_p1 = scmp.lt.s32.totalorder %s5564_s0, %s5564_s0 }
  0x41   :  { %p5571_p2 = por %p5570_p1, %p5569_p0 }
  0x43   :  { %p5572_p3 = pnand %p5571_p2, %p5565_p13 }
  0x45   :  { %5575 = shalt.err (!%p5572_p3)
}
  0x46   :  { %48 = dma.hbm_to_vmem [thread:$0]  %s5899_s2, 64, %s46_s15, [#allocation6]  }
  0x47   :  { %s5576_s28 = scalar_lea.hbm %s5901_s4, 64 }
  0x48   :  { %p5577_p4 = scmp.ne.s32.totalorder %s5901_s4, %s5576_s28  ;;  %p5580_p5 = scmp.lt.u32.totalorder %s5576_s28, %s5901_s4 }
  0x4a   :  { %p5582_p6 = pnand %p5580_p5, %p5577_p4 }
  0x4c   :  { %5585 = shalt.err (!%p5582_p6)
}
  0x4d   :  { %s5586_s10 = scalar_lea.vmem %s68_s17, 64  ;;  %p5591_p8 = scmp.lt.s32.totalorder %s68_s17, %s68_s17 }
  0x4e   :  { %p5587_p7 = scmp.ne.s32.totalorder %s68_s17, %s5586_s10  ;;  %p5592_p9 = scmp.lt.s32.totalorder %s5586_s10, %s5586_s10 }
  0x50   :  { %p5593_p10 = por %p5592_p9, %p5591_p8 }
  0x52   :  { %p5594_p11 = pnand %p5593_p10, %p5587_p7 }
  0x54   :  { %5597 = shalt.err (!%p5594_p11)
}
  0x55   :  { %70 = dma.hbm_to_vmem [thread:$0]  %s5901_s4, 64, %s68_s17, [#allocation9]  }
  0x56   :  { %5598 = dma.done.wait [#allocation4], 128  }
  0x57   :  { %5599 = vsyncadd [#allocation4], 4294967168 }
  0x58   :  { %5600 = dma.done.wait [#allocation6], 12352  }
  0x59   :  { %5601 = vsyncadd [#allocation6], 4294954944 }
  0x5a   :  { %5602 = dma.done.wait [#allocation9], 49216  }
  0x5b   :  { %5603 = vsyncadd [#allocation9], 4294918080  ;;  %v5611_v1 = vmov 0   ;;  %v4736_v2 = vld [vmem:[#allocation5 + $0x4] ss:$48 sps:$4 sm:$0xff]   ;;  %v91_v33 = vld [vmem:[#allocation3] sm:$0xff] }
  0x5c   :  { %701 = vmatprep.mubr.bf16.mxu0 %v5611_v1  ;;  %742 = vmatprep.mubr.bf16.mxu1 %v5611_v1  ;;  %v4738_v3 = vld [vmem:[#allocation5] ss:$48 sps:$4 sm:$0xff]   ;;  %v4739_v4 = vld [vmem:[#allocation5 + $0xc] ss:$48 sps:$4 sm:$0xff]   ;;  %v4741_v5 = vld [vmem:[#allocation5 + $0x8] ss:$48 sps:$4 sm:$0xff]   ;;  %v5717_v36 = vpack.c.bf16 %v91_v33, %v91_v33 }
  0x5d   :  { %669 = vmatprep.subr.bf16.mxu0 %v4736_v2  ;;  %v4742_v6 = vld [vmem:[#allocation5 + $0x64] ss:$48 sps:$4 sm:$0xff]   ;;  %v4744_v7 = vld [vmem:[#allocation5 + $0x60] ss:$48 sps:$4 sm:$0xff]   ;;  %710 = vmatprep.subr.bf16.mxu1 %v4739_v4  ;;  %v4745_v8 = vld [vmem:[#allocation5 + $0x6c] ss:$48 sps:$4 sm:$0xff]  }
  0x5e   :  { %670 = vmatpush1.bf16.msra.mxu0 %v4738_v3  ;;  %711 = vmatpush1.bf16.msra.mxu1 %v4741_v5  ;;  %v4747_v9 = vld [vmem:[#allocation5 + $0x68] ss:$48 sps:$4 sm:$0xff]   ;;  %v4748_v10 = vld [vmem:[#allocation5 + $0xc4] ss:$48 sps:$4 sm:$0xff]   ;;  %v4750_v11 = vld [vmem:[#allocation5 + $0xc0] ss:$48 sps:$4 sm:$0xff]  }
  0x5f   :  { %671 = vmatprep.subr.bf16.mxu0 %v4742_v6  ;;  %712 = vmatprep.subr.bf16.mxu1 %v4745_v8  ;;  %v4751_v12 = vld [vmem:[#allocation5 + $0xcc] ss:$48 sps:$4 sm:$0xff]   ;;  %v4754_v13 = vld [vmem:[#allocation5 + $0x124] ss:$48 sps:$4 sm:$0xff]   ;;  %v4753_v14 = vld [vmem:[#allocation5 + $0xc8] ss:$48 sps:$4 sm:$0xff]  }
  0x60   :  { %v4757_v15 = vld [vmem:[#allocation5 + $0x12c] ss:$48 sps:$4 sm:$0xff]   ;;  %v4756_v16 = vld [vmem:[#allocation5 + $0x120] ss:$48 sps:$4 sm:$0xff]   ;;  %v4760_v17 = vld [vmem:[#allocation5 + $0x184] ss:$48 sps:$4 sm:$0xff]  }
  0x61   :  { %v4759_v18 = vld [vmem:[#allocation5 + $0x128] ss:$48 sps:$4 sm:$0xff]   ;;  %v4763_v19 = vld [vmem:[#allocation5 + $0x18c] ss:$48 sps:$4 sm:$0xff]   ;;  %v4762_v20 = vld [vmem:[#allocation5 + $0x180] ss:$48 sps:$4 sm:$0xff]  }
  0x62   :  { %672 = vmatpush1.bf16.msra.mxu0 %v4744_v7  ;;  %713 = vmatpush1.bf16.msra.mxu1 %v4747_v9  ;;  %v4766_v21 = vld [vmem:[#allocation5 + $0x1e4] ss:$48 sps:$4 sm:$0xff]   ;;  %v4765_v22 = vld [vmem:[#allocation5 + $0x188] ss:$48 sps:$4 sm:$0xff]   ;;  %v4769_v23 = vld [vmem:[#allocation5 + $0x1ec] ss:$48 sps:$4 sm:$0xff]  }
  0x63   :  { %673 = vmatprep.subr.bf16.mxu0 %v4748_v10  ;;  %714 = vmatprep.subr.bf16.mxu1 %v4751_v12  ;;  %v4768_v24 = vld [vmem:[#allocation5 + $0x1e0] ss:$48 sps:$4 sm:$0xff]   ;;  %v4772_v25 = vld [vmem:[#allocation5 + $0x244] ss:$48 sps:$4 sm:$0xff]   ;;  %v4771_v26 = vld [vmem:[#allocation5 + $0x1e8] ss:$48 sps:$4 sm:$0xff]  }
  0x64   :  { %v4775_v27 = vld [vmem:[#allocation5 + $0x24c] ss:$48 sps:$4 sm:$0xff]   ;;  %v4774_v28 = vld [vmem:[#allocation5 + $0x240] ss:$48 sps:$4 sm:$0xff]   ;;  %v4778_v29 = vld [vmem:[#allocation5 + $0x2a4] ss:$48 sps:$4 sm:$0xff]  }
  0x65   :  { %v4777_v30 = vld [vmem:[#allocation5 + $0x248] ss:$48 sps:$4 sm:$0xff]   ;;  %v4780_v31 = vld [vmem:[#allocation5 + $0x2a0] ss:$48 sps:$4 sm:$0xff]   ;;  %v4781_v32 = vld [vmem:[#allocation5 + $0x2ac] ss:$48 sps:$4 sm:$0xff]  }
  0x66   :  { %674 = vmatpush1.bf16.msra.mxu0 %v4750_v11  ;;  %715 = vmatpush1.bf16.msra.mxu1 %v4753_v14  ;;  %v4786_v34 = vld [vmem:[#allocation5 + $0x14] ss:$48 sps:$4 sm:$0xff]   ;;  %v4783_v35 = vld [vmem:[#allocation5 + $0x2a8] ss:$48 sps:$4 sm:$0xff]   ;;  %v4789_v37 = vld [vmem:[#allocation5 + $0x1c] ss:$48 sps:$4 sm:$0xff]  }
  0x67   :  { %675 = vmatprep.subr.bf16.mxu0 %v4754_v13  ;;  %716 = vmatprep.subr.bf16.mxu1 %v4757_v15  ;;  %v4784_v38 = vld [vmem:[#allocation5 + $0x10] ss:$48 sps:$4 sm:$0xff]   ;;  %v4792_v39 = vld [vmem:[#allocation5 + $0x74] ss:$48 sps:$4 sm:$0xff]   ;;  %v4787_v40 = vld [vmem:[#allocation5 + $0x18] ss:$48 sps:$4 sm:$0xff]  }
  0x68   :  { %v4795_v41 = vld [vmem:[#allocation5 + $0x7c] ss:$48 sps:$4 sm:$0xff]   ;;  %v4790_v42 = vld [vmem:[#allocation5 + $0x70] ss:$48 sps:$4 sm:$0xff]   ;;  %v4798_v43 = vld [vmem:[#allocation5 + $0xd4] ss:$48 sps:$4 sm:$0xff]  }
  0x69   :  { %v4793_v44 = vld [vmem:[#allocation5 + $0x78] ss:$48 sps:$4 sm:$0xff]   ;;  %v4801_v45 = vld [vmem:[#allocation5 + $0xdc] ss:$48 sps:$4 sm:$0xff]   ;;  %v4796_v46 = vld [vmem:[#allocation5 + $0xd0] ss:$48 sps:$4 sm:$0xff]  }
  0x6a   :  { %676 = vmatpush1.bf16.msra.mxu0 %v4756_v16  ;;  %717 = vmatpush1.bf16.msra.mxu1 %v4759_v18  ;;  %v4804_v47 = vld [vmem:[#allocation5 + $0x134] ss:$48 sps:$4 sm:$0xff]   ;;  %v4799_v48 = vld [vmem:[#allocation5 + $0xd8] ss:$48 sps:$4 sm:$0xff]   ;;  %v4807_v49 = vld [vmem:[#allocation5 + $0x13c] ss:$48 sps:$4 sm:$0xff]  }
  0x6b   :  { %677 = vmatprep.subr.bf16.mxu0 %v4760_v17  ;;  %718 = vmatprep.subr.bf16.mxu1 %v4763_v19  ;;  %v4802_v50 = vld [vmem:[#allocation5 + $0x130] ss:$48 sps:$4 sm:$0xff]   ;;  %v4810_v51 = vld [vmem:[#allocation5 + $0x194] ss:$48 sps:$4 sm:$0xff]   ;;  %v4805_v52 = vld [vmem:[#allocation5 + $0x138] ss:$48 sps:$4 sm:$0xff]  }
  0x6c   :  { %v4813_v53 = vld [vmem:[#allocation5 + $0x19c] ss:$48 sps:$4 sm:$0xff]   ;;  %v4808_v54 = vld [vmem:[#allocation5 + $0x190] ss:$48 sps:$4 sm:$0xff]   ;;  %v4816_v55 = vld [vmem:[#allocation5 + $0x1f4] ss:$48 sps:$4 sm:$0xff]  }
  0x6d   :  { %v4811_v56 = vld [vmem:[#allocation5 + $0x198] ss:$48 sps:$4 sm:$0xff]   ;;  %v4819_v57 = vld [vmem:[#allocation5 + $0x1fc] ss:$48 sps:$4 sm:$0xff]   ;;  %v4814_v58 = vld [vmem:[#allocation5 + $0x1f0] ss:$48 sps:$4 sm:$0xff]  }
  0x6e   :  { %678 = vmatpush1.bf16.msra.mxu0 %v4762_v20  ;;  %719 = vmatpush1.bf16.msra.mxu1 %v4765_v22  ;;  %v4822_v59 = vld [vmem:[#allocation5 + $0x254] ss:$48 sps:$4 sm:$0xff]   ;;  %v4817_v60 = vld [vmem:[#allocation5 + $0x1f8] ss:$48 sps:$4 sm:$0xff]   ;;  %v4825_v61 = vld [vmem:[#allocation5 + $0x25c] ss:$48 sps:$4 sm:$0xff]  }
  0x6f   :  { %679 = vmatprep.subr.bf16.mxu0 %v4766_v21  ;;  %720 = vmatprep.subr.bf16.mxu1 %v4769_v23  ;;  %v4820_v62 = vld [vmem:[#allocation5 + $0x250] ss:$48 sps:$4 sm:$0xff]   ;;  %v4828_v63 = vld [vmem:[#allocation5 + $0x2b4] ss:$48 sps:$4 sm:$0xff]   ;;  %v4823_v0 = vld [vmem:[#allocation5 + $0x258] ss:$48 sps:$4 sm:$0xff]  }
  0x70   :  { %v4831_v2 = vld [vmem:[#allocation5 + $0x2bc] ss:$48 sps:$4 sm:$0xff]   ;;  %v4826_v3 = vld [vmem:[#allocation5 + $0x2b0] ss:$48 sps:$4 sm:$0xff]   ;;  %v4834_v4 = vld [vmem:[#allocation5 + $0x24] ss:$48 sps:$4 sm:$0xff]  }
  0x71   :  { %v4829_v5 = vld [vmem:[#allocation5 + $0x2b8] ss:$48 sps:$4 sm:$0xff]   ;;  %v4832_v6 = vld [vmem:[#allocation5 + $0x20] ss:$48 sps:$4 sm:$0xff]   ;;  %v4837_v7 = vld [vmem:[#allocation5 + $0x2c] ss:$48 sps:$4 sm:$0xff]  }
  0x72   :  { %680 = vmatpush1.bf16.msra.mxu0 %v4768_v24  ;;  %721 = vmatpush1.bf16.msra.mxu1 %v4771_v26  ;;  %v4835_v8 = vld [vmem:[#allocation5 + $0x28] ss:$48 sps:$4 sm:$0xff]   ;;  %v4840_v9 = vld [vmem:[#allocation5 + $0x84] ss:$48 sps:$4 sm:$0xff]   ;;  %v4843_v10 = vld [vmem:[#allocation5 + $0x8c] ss:$48 sps:$4 sm:$0xff]  }
  0x73   :  { %681 = vmatprep.subr.bf16.mxu0 %v4772_v25  ;;  %722 = vmatprep.subr.bf16.mxu1 %v4775_v27  ;;  %v4838_v11 = vld [vmem:[#allocation5 + $0x80] ss:$48 sps:$4 sm:$0xff]   ;;  %v4846_v12 = vld [vmem:[#allocation5 + $0xe4] ss:$48 sps:$4 sm:$0xff]   ;;  %v4841_v13 = vld [vmem:[#allocation5 + $0x88] ss:$48 sps:$4 sm:$0xff]  }
  0x74   :  { %v4849_v14 = vld [vmem:[#allocation5 + $0xec] ss:$48 sps:$4 sm:$0xff]   ;;  %v4844_v15 = vld [vmem:[#allocation5 + $0xe0] ss:$48 sps:$4 sm:$0xff]   ;;  %v4852_v16 = vld [vmem:[#allocation5 + $0x144] ss:$48 sps:$4 sm:$0xff]  }
  0x75   :  { %v4847_v17 = vld [vmem:[#allocation5 + $0xe8] ss:$48 sps:$4 sm:$0xff]   ;;  %v4855_v18 = vld [vmem:[#allocation5 + $0x14c] ss:$48 sps:$4 sm:$0xff]   ;;  %v4850_v19 = vld [vmem:[#allocation5 + $0x140] ss:$48 sps:$4 sm:$0xff]  }
  0x76   :  { %682 = vmatpush1.bf16.msra.mxu0 %v4774_v28  ;;  %723 = vmatpush1.bf16.msra.mxu1 %v4777_v30  ;;  %v4858_v20 = vld [vmem:[#allocation5 + $0x1a4] ss:$48 sps:$4 sm:$0xff]   ;;  %v4853_v21 = vld [vmem:[#allocation5 + $0x148] ss:$48 sps:$4 sm:$0xff]   ;;  %v4861_v22 = vld [vmem:[#allocation5 + $0x1ac] ss:$48 sps:$4 sm:$0xff]  }
  0x77   :  { %683 = vmatprep.subr.bf16.mxu0 %v4778_v29  ;;  %724 = vmatprep.subr.bf16.mxu1 %v4781_v32  ;;  %v4856_v23 = vld [vmem:[#allocation5 + $0x1a0] ss:$48 sps:$4 sm:$0xff]   ;;  %v4864_v24 = vld [vmem:[#allocation5 + $0x204] ss:$48 sps:$4 sm:$0xff]   ;;  %v4867_v25 = vld [vmem:[#allocation5 + $0x20c] ss:$48 sps:$4 sm:$0xff]  }
  0x78   :  { %v4862_v26 = vld [vmem:[#allocation5 + $0x200] ss:$48 sps:$4 sm:$0xff]   ;;  %v4870_v27 = vld [vmem:[#allocation5 + $0x264] ss:$48 sps:$4 sm:$0xff]   ;;  %v4865_v28 = vld [vmem:[#allocation5 + $0x208] ss:$48 sps:$4 sm:$0xff]  }
  0x79   :  { %v4873_v29 = vld [vmem:[#allocation5 + $0x26c] ss:$48 sps:$4 sm:$0xff]   ;;  %v4868_v30 = vld [vmem:[#allocation5 + $0x260] ss:$48 sps:$4 sm:$0xff]   ;;  %v4871_v32 = vld [vmem:[#allocation5 + $0x268] ss:$48 sps:$4 sm:$0xff]  }
  0x7a   :  { %684 = vmatpush1.bf16.msra.mxu0 %v4780_v31  ;;  %725 = vmatpush1.bf16.msra.mxu1 %v4783_v35  ;;  %v4876_v31 = vld [vmem:[#allocation5 + $0x2c4] ss:$48 sps:$4 sm:$0xff]   ;;  %v4879_v33 = vld [vmem:[#allocation5 + $0x2cc] ss:$48 sps:$4 sm:$0xff]   ;;  %v4877_v35 = vld [vmem:[#allocation5 + $0x2c8] ss:$48 sps:$4 sm:$0xff]  }
  0x7b   :  { %751 = vmatprep.subr.bf16.mxu0 %v4786_v34  ;;  %792 = vmatprep.subr.bf16.mxu1 %v4789_v37  ;;  %v4874_v34 = vld [vmem:[#allocation5 + $0x2c0] ss:$48 sps:$4 sm:$0xff]   ;;  %v4880_v37 = vld [vmem:[#allocation8] ss:$48 sps:$4 sm:$0xff]   ;;  %vm4138_vm0 = vcmask 7168  }
  0x7d   :  { %702 = vmatmul.mubr.bf16.vlgmr.msra.gmra.mrb[0].mxu0 %v5717_v36  ;;  %743 = vmatmul.mubr.bf16.vlgmr.msra.gmra.mrb[0].mxu1 %v5717_v36 }
  0x7e   :  { %752 = vmatpush1.bf16.msra.mxu0 %v4784_v38  ;;  %783 = vmatprep.mubr.bf16.mxu0 %v5611_v1  ;;  %v4882_v38 = vld [vmem:[#allocation8 + $0x4] ss:$48 sps:$4 sm:$0xff]  }
  0x7f   :  { %753 = vmatprep.subr.bf16.mxu0 %v4792_v39  ;;  %793 = vmatpush1.bf16.msra.mxu1 %v4787_v40  ;;  %v4883_v39 = vld [vmem:[#allocation8 + $0x8] ss:$48 sps:$4 sm:$0xff]   ;;  %v4885_v40 = vld [vmem:[#allocation8 + $0xc] ss:$48 sps:$4 sm:$0xff]  }
  0x80   :  { %824 = vmatprep.mubr.bf16.mxu1 %v5611_v1  ;;  %794 = vmatprep.subr.bf16.mxu1 %v4795_v41  ;;  %v4888_v41 = vld [vmem:[#allocation8 + $0x64] ss:$48 sps:$4 sm:$0xff]  }
  0x82   :  { %754 = vmatpush1.bf16.msra.mxu0 %v4790_v42  ;;  %v4891_v42 = vld [vmem:[#allocation8 + $0x6c] ss:$48 sps:$4 sm:$0xff]  }
  0x83   :  { %755 = vmatprep.subr.bf16.mxu0 %v4798_v43  ;;  %795 = vmatpush1.bf16.msra.mxu1 %v4793_v44  ;;  %v4886_v43 = vld [vmem:[#allocation8 + $0x60] ss:$48 sps:$4 sm:$0xff]   ;;  %v4889_v44 = vld [vmem:[#allocation8 + $0x68] ss:$48 sps:$4 sm:$0xff]  }
  0x84   :  { %796 = vmatprep.subr.bf16.mxu1 %v4801_v45  ;;  %v4894_v45 = vld [vmem:[#allocation8 + $0xc4] ss:$48 sps:$4 sm:$0xff]  }
  0x86   :  { %756 = vmatpush1.bf16.msra.mxu0 %v4796_v46  ;;  %v4897_v46 = vld [vmem:[#allocation8 + $0xcc] ss:$48 sps:$4 sm:$0xff]  }
  0x87   :  { %757 = vmatprep.subr.bf16.mxu0 %v4804_v47  ;;  %797 = vmatpush1.bf16.msra.mxu1 %v4799_v48  ;;  %v4892_v47 = vld [vmem:[#allocation8 + $0xc0] ss:$48 sps:$4 sm:$0xff]   ;;  %v4895_v48 = vld [vmem:[#allocation8 + $0xc8] ss:$48 sps:$4 sm:$0xff]  }
  0x88   :  { %798 = vmatprep.subr.bf16.mxu1 %v4807_v49  ;;  %v4903_v49 = vld [vmem:[#allocation8 + $0x12c] ss:$48 sps:$4 sm:$0xff]  }
  0x8a   :  { %758 = vmatpush1.bf16.msra.mxu0 %v4802_v50  ;;  %v4898_v50 = vld [vmem:[#allocation8 + $0x120] ss:$48 sps:$4 sm:$0xff]  }
  0x8b   :  { %759 = vmatprep.subr.bf16.mxu0 %v4810_v51  ;;  %799 = vmatpush1.bf16.msra.mxu1 %v4805_v52  ;;  %v4901_v51 = vld [vmem:[#allocation8 + $0x128] ss:$48 sps:$4 sm:$0xff]   ;;  %v4906_v52 = vld [vmem:[#allocation8 + $0x184] ss:$48 sps:$4 sm:$0xff]  }
  0x8c   :  { %800 = vmatprep.subr.bf16.mxu1 %v4813_v53  ;;  %v4909_v53 = vld [vmem:[#allocation8 + $0x18c] ss:$48 sps:$4 sm:$0xff]  }
  0x8e   :  { %760 = vmatpush1.bf16.msra.mxu0 %v4808_v54  ;;  %v4904_v54 = vld [vmem:[#allocation8 + $0x180] ss:$48 sps:$4 sm:$0xff]  }
  0x8f   :  { %761 = vmatprep.subr.bf16.mxu0 %v4816_v55  ;;  %801 = vmatpush1.bf16.msra.mxu1 %v4811_v56  ;;  %v4907_v55 = vld [vmem:[#allocation8 + $0x188] ss:$48 sps:$4 sm:$0xff]   ;;  %v4912_v56 = vld [vmem:[#allocation8 + $0x1e4] ss:$48 sps:$4 sm:$0xff]  }
  0x90   :  { %802 = vmatprep.subr.bf16.mxu1 %v4819_v57  ;;  %v4915_v57 = vld [vmem:[#allocation8 + $0x1ec] ss:$48 sps:$4 sm:$0xff]  }
  0x92   :  { %762 = vmatpush1.bf16.msra.mxu0 %v4814_v58  ;;  %v4910_v58 = vld [vmem:[#allocation8 + $0x1e0] ss:$48 sps:$4 sm:$0xff]  }
  0x93   :  { %763 = vmatprep.subr.bf16.mxu0 %v4822_v59  ;;  %803 = vmatpush1.bf16.msra.mxu1 %v4817_v60  ;;  %v4913_v59 = vld [vmem:[#allocation8 + $0x1e8] ss:$48 sps:$4 sm:$0xff]   ;;  %v4918_v60 = vld [vmem:[#allocation8 + $0x244] ss:$48 sps:$4 sm:$0xff]  }
  0x94   :  { %804 = vmatprep.subr.bf16.mxu1 %v4825_v61  ;;  %v4921_v61 = vld [vmem:[#allocation8 + $0x24c] ss:$48 sps:$4 sm:$0xff]  }
  0x96   :  { %764 = vmatpush1.bf16.msra.mxu0 %v4820_v62  ;;  %v4916_v62 = vld [vmem:[#allocation8 + $0x240] ss:$48 sps:$4 sm:$0xff]  }
  0x97   :  { %765 = vmatprep.subr.bf16.mxu0 %v4828_v63  ;;  %805 = vmatpush1.bf16.msra.mxu1 %v4823_v0  ;;  %v4919_v63 = vld [vmem:[#allocation8 + $0x248] ss:$48 sps:$4 sm:$0xff]   ;;  %v4922_v0 = vld [vmem:[#allocation8 + $0x2a0] ss:$48 sps:$4 sm:$0xff]  }
  0x98   :  { %806 = vmatprep.subr.bf16.mxu1 %v4831_v2  ;;  %v4924_v2 = vld [vmem:[#allocation8 + $0x2a4] ss:$48 sps:$4 sm:$0xff]  }
  0x9a   :  { %766 = vmatpush1.bf16.msra.mxu0 %v4826_v3  ;;  %v4925_v3 = vld [vmem:[#allocation8 + $0x2a8] ss:$48 sps:$4 sm:$0xff]  }
  0x9b   :  { %833 = vmatprep.subr.bf16.mxu0 %v4834_v4  ;;  %807 = vmatpush1.bf16.msra.mxu1 %v4829_v5  ;;  %v4927_v4 = vld [vmem:[#allocation8 + $0x2ac] ss:$48 sps:$4 sm:$0xff]   ;;  %v4930_v5 = vld [vmem:[#allocation8 + $0x304] ss:$48 sps:$4 sm:$0xff]  }
  0x9c   :  { %874 = vmatprep.subr.bf16.mxu1 %v4837_v7  ;;  %v4928_v7 = vld [vmem:[#allocation8 + $0x300] ss:$48 sps:$4 sm:$0xff]  }
  0x9d   :  { %784 = vmatmul.mubr.bf16.vlgmr.msra.gmra.mrb[4].mxu0 %v5717_v36 }
  0x9e   :  { %834 = vmatpush1.bf16.msra.mxu0 %v4832_v6  ;;  %865 = vmatprep.mubr.bf16.mxu0 %v5611_v1  ;;  %v4933_v6 = vld [vmem:[#allocation8 + $0x30c] ss:$48 sps:$4 sm:$0xff]  }
  0x9f   :  { %825 = vmatmul.mubr.bf16.vlgmr.msra.gmra.mrb[4].mxu1 %v5717_v36  ;;  %835 = vmatprep.subr.bf16.mxu0 %v4840_v9  ;;  %v4936_v9 = vld [vmem:[#allocation8 + $0x364] ss:$48 sps:$4 sm:$0xff]  }
  0xa0   :  { %875 = vmatpush1.bf16.msra.mxu1 %v4835_v8  ;;  %906 = vmatprep.mubr.bf16.mxu1 %v5611_v1  ;;  %v4859_v1 = vld [vmem:[#allocation5 + $0x1a8] ss:$48 sps:$4 sm:$0xff]   ;;  %v4931_v8 = vld [vmem:[#allocation8 + $0x308] ss:$48 sps:$4 sm:$0xff]  }
  0xa1   :  { %876 = vmatprep.subr.bf16.mxu1 %v4843_v10  ;;  %v4939_v10 = vld [vmem:[#allocation8 + $0x36c] ss:$48 sps:$4 sm:$0xff]  }
  0xa2   :  { %836 = vmatpush1.bf16.msra.mxu0 %v4838_v11  ;;  %v4934_v11 = vld [vmem:[#allocation8 + $0x360] ss:$48 sps:$4 sm:$0xff]  }
  0xa3   :  { %837 = vmatprep.subr.bf16.mxu0 %v4846_v12  ;;  %v4937_v12 = vld [vmem:[#allocation8 + $0x368] ss:$48 sps:$4 sm:$0xff]  }
  0xa4   :  { %877 = vmatpush1.bf16.msra.mxu1 %v4841_v13  ;;  %v4942_v13 = vld [vmem:[#allocation8 + $0x3c4] ss:$48 sps:$4 sm:$0xff]  }
  0xa5   :  { %878 = vmatprep.subr.bf16.mxu1 %v4849_v14  ;;  %v4945_v14 = vld [vmem:[#allocation8 + $0x3cc] ss:$48 sps:$4 sm:$0xff]  }
  0xa6   :  { %838 = vmatpush1.bf16.msra.mxu0 %v4844_v15  ;;  %v4940_v15 = vld [vmem:[#allocation8 + $0x3c0] ss:$48 sps:$4 sm:$0xff]  }
  0xa7   :  { %839 = vmatprep.subr.bf16.mxu0 %v4852_v16  ;;  %v4943_v16 = vld [vmem:[#allocation8 + $0x3c8] ss:$48 sps:$4 sm:$0xff]  }
  0xa8   :  { %879 = vmatpush1.bf16.msra.mxu1 %v4847_v17  ;;  %v4948_v17 = vld [vmem:[#allocation8 + $0x424] ss:$48 sps:$4 sm:$0xff]  }
  0xa9   :  { %880 = vmatprep.subr.bf16.mxu1 %v4855_v18  ;;  %v4951_v18 = vld [vmem:[#allocation8 + $0x42c] ss:$48 sps:$4 sm:$0xff]  }
  0xaa   :  { %840 = vmatpush1.bf16.msra.mxu0 %v4850_v19  ;;  %v4946_v19 = vld [vmem:[#allocation8 + $0x420] ss:$48 sps:$4 sm:$0xff]  }
  0xab   :  { %841 = vmatprep.subr.bf16.mxu0 %v4858_v20  ;;  %v4949_v20 = vld [vmem:[#allocation8 + $0x428] ss:$48 sps:$4 sm:$0xff]  }
  0xac   :  { %881 = vmatpush1.bf16.msra.mxu1 %v4853_v21  ;;  %v4954_v21 = vld [vmem:[#allocation8 + $0x484] ss:$48 sps:$4 sm:$0xff]  }
  0xad   :  { %882 = vmatprep.subr.bf16.mxu1 %v4861_v22  ;;  %v4957_v22 = vld [vmem:[#allocation8 + $0x48c] ss:$48 sps:$4 sm:$0xff]  }
  0xae   :  { %842 = vmatpush1.bf16.msra.mxu0 %v4856_v23  ;;  %v4952_v23 = vld [vmem:[#allocation8 + $0x480] ss:$48 sps:$4 sm:$0xff]  }
  0xaf   :  { %843 = vmatprep.subr.bf16.mxu0 %v4864_v24  ;;  %v4955_v24 = vld [vmem:[#allocation8 + $0x488] ss:$48 sps:$4 sm:$0xff]  }
  0xb0   :  { %883 = vmatpush1.bf16.msra.mxu1 %v4859_v1  ;;  %v4960_v1 = vld [vmem:[#allocation8 + $0x4e4] ss:$48 sps:$4 sm:$0xff]  }
  0xb1   :  { %884 = vmatprep.subr.bf16.mxu1 %v4867_v25  ;;  %v4963_v25 = vld [vmem:[#allocation8 + $0x4ec] ss:$48 sps:$4 sm:$0xff]  }
  0xb2   :  { %844 = vmatpush1.bf16.msra.mxu0 %v4862_v26  ;;  %v4958_v26 = vld [vmem:[#allocation8 + $0x4e0] ss:$48 sps:$4 sm:$0xff]  }
  0xb3   :  { %845 = vmatprep.subr.bf16.mxu0 %v4870_v27  ;;  %v4961_v27 = vld [vmem:[#allocation8 + $0x4e8] ss:$48 sps:$4 sm:$0xff]  }
  0xb4   :  { %885 = vmatpush1.bf16.msra.mxu1 %v4865_v28  ;;  %v4966_v28 = vld [vmem:[#allocation8 + $0x544] ss:$48 sps:$4 sm:$0xff]  }
  0xb5   :  { %886 = vmatprep.subr.bf16.mxu1 %v4873_v29  ;;  %v4964_v29 = vld [vmem:[#allocation8 + $0x540] ss:$48 sps:$4 sm:$0xff]  }
  0xb6   :  { %846 = vmatpush1.bf16.msra.mxu0 %v4868_v30  ;;  %v4967_v30 = vld [vmem:[#allocation8 + $0x548] ss:$48 sps:$4 sm:$0xff]  }
  0xb7   :  { %847 = vmatprep.subr.bf16.mxu0 %v4876_v31  ;;  %v4969_v31 = vld [vmem:[#allocation8 + $0x54c] ss:$48 sps:$4 sm:$0xff]  }
  0xb8   :  { %887 = vmatpush1.bf16.msra.mxu1 %v4871_v32  ;;  %v4972_v32 = vld [vmem:[#allocation8 + $0x5a4] ss:$48 sps:$4 sm:$0xff]  }
  0xb9   :  { %888 = vmatprep.subr.bf16.mxu1 %v4879_v33  ;;  %v4975_v33 = vld [vmem:[#allocation8 + $0x5ac] ss:$48 sps:$4 sm:$0xff]  }
  0xba   :  { %848 = vmatpush1.bf16.msra.mxu0 %v4874_v34  ;;  %v4970_v34 = vld [vmem:[#allocation8 + $0x5a0] ss:$48 sps:$4 sm:$0xff]  }
  0xbb   :  { %3261 = vmatprep.subr.bf16.mxu0 %v4882_v38  ;;  %v4981_v38 = vld [vmem:[#allocation8 + $0x60c] ss:$48 sps:$4 sm:$0xff]  }
  0xbc   :  { %889 = vmatpush1.bf16.msra.mxu1 %v4877_v35  ;;  %v4973_v35 = vld [vmem:[#allocation8 + $0x5a8] ss:$48 sps:$4 sm:$0xff]  }
  0xbd   :  { %866 = vmatmul.mubr.bf16.vlgmr.msra.gmra.mrb[8].mxu0 %v5717_v36  ;;  %3343 = vmatprep.subr.bf16.mxu1 %v4885_v40 }
  0xbe   :  { %3262 = vmatpush1.bf16.msra.mxu0 %v4880_v37  ;;  %v4978_v37 = vld [vmem:[#allocation8 + $0x604] ss:$48 sps:$4 sm:$0xff]  }
  0xbf   :  { %907 = vmatmul.mubr.bf16.vlgmr.msra.gmra.mrb[8].mxu1 %v5717_v36  ;;  %3263 = vmatprep.subr.bf16.mxu0 %v4888_v41  ;;  %v4900_v36 = vld [vmem:[#allocation8 + $0x124] ss:$48 sps:$4 sm:$0xff]  }
  0xc0   :  { %3344 = vmatpush1.bf16.msra.mxu1 %v4883_v39 }
  0xc1   :  { %3345 = vmatprep.subr.bf16.mxu1 %v4891_v42 }
  0xc2   :  { %3264 = vmatpush1.bf16.msra.mxu0 %v4886_v43 }
  0xc3   :  { %3265 = vmatprep.subr.bf16.mxu0 %v4894_v45 }
  0xc4   :  { %3346 = vmatpush1.bf16.msra.mxu1 %v4889_v44 }
  0xc5   :  { %3347 = vmatprep.subr.bf16.mxu1 %v4897_v46 }
  0xc6   :  { %3266 = vmatpush1.bf16.msra.mxu0 %v4892_v47 }
  0xc7   :  { %3267 = vmatprep.subr.bf16.mxu0 %v4900_v36 }
  0xc8   :  { %3348 = vmatpush1.bf16.msra.mxu1 %v4895_v48 }
  0xc9   :  { %3349 = vmatprep.subr.bf16.mxu1 %v4903_v49 }
  0xca   :  { %3268 = vmatpush1.bf16.msra.mxu0 %v4898_v50 }
  0xcb   :  { %3269 = vmatprep.subr.bf16.mxu0 %v4906_v52 }
  0xcc   :  { %3350 = vmatpush1.bf16.msra.mxu1 %v4901_v51 }
  0xcd   :  { %3351 = vmatprep.subr.bf16.mxu1 %v4909_v53 }
  0xce   :  { %3270 = vmatpush1.bf16.msra.mxu0 %v4904_v54 }
  0xcf   :  { %3271 = vmatprep.subr.bf16.mxu0 %v4912_v56 }
  0xd0   :  { %3352 = vmatpush1.bf16.msra.mxu1 %v4907_v55 }
  0xd1   :  { %3353 = vmatprep.subr.bf16.mxu1 %v4915_v57 }
  0xd2   :  { %3272 = vmatpush1.bf16.msra.mxu0 %v4910_v58  ;;  %v925_v58 = vlaneseq }
  0xd3   :  { %3273 = vmatprep.subr.bf16.mxu0 %v4918_v60 }
  0xd4   :  { %3354 = vmatpush1.bf16.msra.mxu1 %v4913_v59  ;;  %v5729_v59 = vshrl.u32 %v925_v58, 7  ;;  %v5029_v58 = vld [vmem:[#allocation8 + $0x90c] ss:$48 sps:$4 sm:$0xff]  }
  0xd5   :  { %3355 = vmatprep.subr.bf16.mxu1 %v4921_v61  ;;  %v923_v61 = vld [vmem:[#allocation7] sm:$0xf] }
  0xd6   :  { %3274 = vmatpush1.bf16.msra.mxu0 %v4916_v62  ;;  %v927_v60 = vsub.s32 0, %v5729_v59  ;;  %v931_v62 = vsub.s32 1, %v5729_v59 }
  0xd7   :  { %3275 = vmatprep.subr.bf16.mxu0 %v4924_v2 }
  0xd8   :  { %3356 = vmatpush1.bf16.msra.mxu1 %v4919_v63  ;;  %v935_v63 = vsub.s32 2, %v5729_v59  ;;  %v928_v2 = vrot.slane %v923_v61, %v927_v60 }
  0xd9   :  { %3357 = vmatprep.subr.bf16.mxu1 %v4927_v4  ;;  %v932_v4 = vrot.slane %v923_v61, %v931_v62 }
  0xda   :  { %3276 = vmatpush1.bf16.msra.mxu0 %v4922_v0  ;;  %v939_v0 = vsub.s32 3, %v5729_v59 }
  0xdb   :  { %3277 = vmatprep.subr.bf16.mxu0 %v4930_v5 }
  0xdc   :  { %3358 = vmatpush1.bf16.msra.mxu1 %v4925_v3 }
  0xdd   :  { %3359 = vmatprep.subr.bf16.mxu1 %v4933_v6 }
  0xde   :  { %3278 = vmatpush1.bf16.msra.mxu0 %v4928_v7  ;;  %v936_v7 = vrot.slane %v923_v61, %v935_v63 }
  0xdf   :  { %3279 = vmatprep.subr.bf16.mxu0 %v4936_v9 }
  0xe0   :  { %3360 = vmatpush1.bf16.msra.mxu1 %v4931_v8 }
  0xe1   :  { %3361 = vmatprep.subr.bf16.mxu1 %v4939_v10 }
  0xe2   :  { %3280 = vmatpush1.bf16.msra.mxu0 %v4934_v11  ;;  %v940_v11 = vrot.slane %v923_v61, %v939_v0  ;;  %v5024_v61 = vld [vmem:[#allocation8 + $0x900] ss:$48 sps:$4 sm:$0xff]  }
  0xe3   :  { %3281 = vmatprep.subr.bf16.mxu0 %v4942_v13 }
  0xe4   :  { %3362 = vmatpush1.bf16.msra.mxu1 %v4937_v12 }
  0xe5   :  { %3363 = vmatprep.subr.bf16.mxu1 %v4945_v14 }
  0xe6   :  { %3282 = vmatpush1.bf16.msra.mxu0 %v4940_v15 }
  0xe7   :  { %3283 = vmatprep.subr.bf16.mxu0 %v4948_v17 }
  0xe8   :  { %3364 = vmatpush1.bf16.msra.mxu1 %v4943_v16 }
  0xe9   :  { %3365 = vmatprep.subr.bf16.mxu1 %v4951_v18 }
  0xea   :  { %3284 = vmatpush1.bf16.msra.mxu0 %v4946_v19 }
  0xeb   :  { %3285 = vmatprep.subr.bf16.mxu0 %v4954_v21 }
  0xec   :  { %3366 = vmatpush1.bf16.msra.mxu1 %v4949_v20 }
  0xed   :  { %3367 = vmatprep.subr.bf16.mxu1 %v4957_v22 }
  0xee   :  { %3286 = vmatpush1.bf16.msra.mxu0 %v4952_v23 }
  0xef   :  { %3287 = vmatprep.subr.bf16.mxu0 %v4960_v1 }
  0xf0   :  { %3368 = vmatpush1.bf16.msra.mxu1 %v4955_v24 }
  0xf1   :  { %3369 = vmatprep.subr.bf16.mxu1 %v4963_v25  ;;  %v4976_v25 = vld [vmem:[#allocation8 + $0x600] ss:$48 sps:$4 sm:$0xff]  }
  0xf2   :  { %3288 = vmatpush1.bf16.msra.mxu0 %v4958_v26  ;;  %v4979_v26 = vld [vmem:[#allocation8 + $0x608] ss:$48 sps:$4 sm:$0xff]  }
  0xf3   :  { %3289 = vmatprep.subr.bf16.mxu0 %v4966_v28 }
  0xf4   :  { %3370 = vmatpush1.bf16.msra.mxu1 %v4961_v27 }
  0xf5   :  { %3371 = vmatprep.subr.bf16.mxu1 %v4969_v31  ;;  %v4982_v31 = vld [vmem:[#allocation8 + $0x660] ss:$48 sps:$4 sm:$0xff]  }
  0xf6   :  { %3290 = vmatpush1.bf16.msra.mxu0 %v4964_v29  ;;  %v4984_v29 = vld [vmem:[#allocation8 + $0x664] ss:$48 sps:$4 sm:$0xff]  }
  0xf7   :  { %3291 = vmatprep.subr.bf16.mxu0 %v4972_v32  ;;  %v4985_v32 = vld [vmem:[#allocation8 + $0x668] ss:$48 sps:$4 sm:$0xff]  }
  0xf8   :  { %3372 = vmatpush1.bf16.msra.mxu1 %v4967_v30  ;;  %v4987_v30 = vld [vmem:[#allocation8 + $0x66c] ss:$48 sps:$4 sm:$0xff]  }
  0xf9   :  { %3373 = vmatprep.subr.bf16.mxu1 %v4975_v33  ;;  %v4990_v33 = vld [vmem:[#allocation8 + $0x6c4] ss:$48 sps:$4 sm:$0xff]  }
  0xfa   :  { %3292 = vmatpush1.bf16.msra.mxu0 %v4970_v34  ;;  %v4993_v34 = vld [vmem:[#allocation8 + $0x6cc] ss:$48 sps:$4 sm:$0xff]  }
  0xfb   :  { %3302 = vmatprep.subr.bf16.mxu0 %v4978_v37  ;;  %v4991_v37 = vld [vmem:[#allocation8 + $0x6c8] ss:$48 sps:$4 sm:$0xff]  }
  0xfc   :  { %3374 = vmatpush1.bf16.msra.mxu1 %v4973_v35  ;;  %v4988_v35 = vld [vmem:[#allocation8 + $0x6c0] ss:$48 sps:$4 sm:$0xff]  }
  0xfd   :  { %3384 = vmatprep.subr.bf16.mxu1 %v4981_v38  ;;  %v4996_v38 = vld [vmem:[#allocation8 + $0x724] ss:$48 sps:$4 sm:$0xff]  }
 0x150   :  { %v703_v39 = vpop.f32.mrb[0].mxu0  ;;  %v744_v42 = vpop.f32.mrb[0].mxu1 }
 0x151   :  { %v705_v40 = vpop.f32.mrb[1].mxu0  ;;  %v746_v44 = vpop.f32.mrb[1].mxu1 }
 0x152   :  { %v707_v41 = vpop.f32.mrb[2].mxu0  ;;  %v748_v45 = vpop.f32.mrb[2].mxu1 }
 0x153   :  { %v708_v43 = vpop.f32.mrb[3].mxu0  ;;  %v749_v46 = vpop.f32.mrb[3].mxu1  ;;  %v4997_v41 = vld [vmem:[#allocation8 + $0x728] ss:$48 sps:$4 sm:$0xff]  }
 0x154   :  { %v5005_v43 = vld [vmem:[#allocation8 + $0x78c] ss:$48 sps:$4 sm:$0xff]   ;;  %v5003_v45 = vld [vmem:[#allocation8 + $0x788] ss:$48 sps:$4 sm:$0xff]   ;;  %v5008_v46 = vld [vmem:[#allocation8 + $0x7e4] ss:$48 sps:$4 sm:$0xff]  }
 0x170   :  { %v785_v47 = vpop.f32.mrb[4].mxu0 }
 0x171   :  { %v915_v48 = vmax.f32 %v703_v39, %v785_v47  ;;  %v787_v36 = vpop.f32.mrb[5].mxu0  ;;  %v4999_v39 = vld [vmem:[#allocation8 + $0x72c] ss:$48 sps:$4 sm:$0xff]  }
 0x172   :  { %v916_v49 = vmax.f32 %v705_v40, %v787_v36  ;;  %v789_v50 = vpop.f32.mrb[6].mxu0  ;;  %v826_v51 = vpop.f32.mrb[4].mxu1  ;;  %v4994_v40 = vld [vmem:[#allocation8 + $0x720] ss:$48 sps:$4 sm:$0xff]   ;;  %v5011_v47 = vld [vmem:[#allocation8 + $0x7ec] ss:$48 sps:$4 sm:$0xff]  }
 0x173   :  { %v790_v52 = vpop.f32.mrb[7].mxu0  ;;  %v917_v53 = vmax.f32 %v744_v42, %v826_v51  ;;  %v828_v54 = vpop.f32.mrb[5].mxu1  ;;  %v5002_v42 = vld [vmem:[#allocation8 + $0x784] ss:$48 sps:$4 sm:$0xff]   ;;  %v5009_v36 = vld [vmem:[#allocation8 + $0x7e8] ss:$48 sps:$4 sm:$0xff]  }
 0x174   :  { %v918_v55 = vmax.f32 %v746_v44, %v828_v54  ;;  %v830_v56 = vpop.f32.mrb[6].mxu1  ;;  %v5000_v44 = vld [vmem:[#allocation8 + $0x780] ss:$48 sps:$4 sm:$0xff]   ;;  %v5017_v50 = vld [vmem:[#allocation8 + $0x84c] ss:$48 sps:$4 sm:$0xff]  }
 0x175   :  { %v831_v57 = vpop.f32.mrb[7].mxu1  ;;  %v5012_v51 = vld [vmem:[#allocation8 + $0x840] ss:$48 sps:$4 sm:$0xff]   ;;  %v5015_v52 = vld [vmem:[#allocation8 + $0x848] ss:$48 sps:$4 sm:$0xff]  }
 0x176   :  { %v5023_v54 = vld [vmem:[#allocation8 + $0x8ac] ss:$48 sps:$4 sm:$0xff]   ;;  %v5021_v56 = vld [vmem:[#allocation8 + $0x8a8] ss:$48 sps:$4 sm:$0xff]   ;;  %v5026_v57 = vld [vmem:[#allocation8 + $0x904] ss:$48 sps:$4 sm:$0xff]  }
 0x190   :  { %v867_v3 = vpop.f32.mrb[8].mxu0 }
 0x191   :  { %v919_v5 = vmax.f32 %v915_v48, %v867_v3  ;;  %v869_v6 = vpop.f32.mrb[9].mxu0  ;;  %v5006_v48 = vld [vmem:[#allocation8 + $0x7e0] ss:$48 sps:$4 sm:$0xff]   ;;  %v5032_v3 = vld [vmem:[#allocation8 + $0x964] ss:$48 sps:$4 sm:$0xff]  }
 0x192   :  { %v920_v8 = vmax.f32 %v916_v49, %v869_v6  ;;  %v871_v9 = vpop.f32.mrb[10].mxu0  ;;  %v908_v10 = vpop.f32.mrb[8].mxu1  ;;  %v5014_v49 = vld [vmem:[#allocation8 + $0x844] ss:$48 sps:$4 sm:$0xff]   ;;  %v5033_v6 = vld [vmem:[#allocation8 + $0x968] ss:$48 sps:$4 sm:$0xff]  }
 0x193   :  { %v945_v12 = vadd.f32 %v928_v2, %v919_v5  ;;  %v921_v13 = vmax.f32 %v917_v53, %v908_v10  ;;  %v872_v14 = vpop.f32.mrb[11].mxu0  ;;  %v910_v15 = vpop.f32.mrb[9].mxu1  ;;  %v5020_v53 = vld [vmem:[#allocation8 + $0x8a4] ss:$48 sps:$4 sm:$0xff]   ;;  %v5027_v2 = vld [vmem:[#allocation8 + $0x908] ss:$48 sps:$4 sm:$0xff]  }
 0x194   :  { %v946_v16 = vadd.f32 %v932_v4, %v920_v8  ;;  %v922_v17 = vmax.f32 %v918_v55, %v910_v15  ;;  %v912_v18 = vpop.f32.mrb[10].mxu1  ;;  %v5018_v55 = vld [vmem:[#allocation8 + $0x8a0] ss:$48 sps:$4 sm:$0xff]   ;;  %v5035_v4 = vld [vmem:[#allocation8 + $0x96c] ss:$48 sps:$4 sm:$0xff]  }
 0x195   :  { %v949_v19 = vmax.f32 %v945_v12, 0.0  ;;  %v5743_v20 = vadd.f32 %v936_v7, %v921_v13  ;;  %v913_v21 = vpop.f32.mrb[11].mxu1  ;;  %v5030_v5 = vld [vmem:[#allocation8 + $0x960] ss:$48 sps:$4 sm:$0xff]   ;;  %v5038_v7 = vld [vmem:[#allocation8 + $0x9c4] ss:$48 sps:$4 sm:$0xff]  }
 0x196   :  { %v950_v22 = vmax.f32 %v946_v16, 0.0  ;;  %v948_v23 = vadd.f32 %v940_v11, %v922_v17  ;;  %v5041_v8 = vld [vmem:[#allocation8 + $0x9cc] ss:$48 sps:$4 sm:$0xff]   ;;  %v5036_v9 = vld [vmem:[#allocation8 + $0x9c0] ss:$48 sps:$4 sm:$0xff]  }
 0x197   :  { %v5747_v27 = vpack.c.bf16 %v949_v19, %v949_v19  ;;  %v5039_v10 = vld [vmem:[#allocation8 + $0x9c8] ss:$48 sps:$4 sm:$0xff]   ;;  %v5044_v11 = vld [vmem:[#allocation8 + $0xa24] ss:$48 sps:$4 sm:$0xff]   ;;  %v5047_v12 = vld [vmem:[#allocation8 + $0xa2c] ss:$48 sps:$4 sm:$0xff]  }
 0x198   :  { %v5745_v24 = vpack.c.bf16 %v950_v22, %v950_v22  ;;  %v952_v1 = vmax.f32 %v948_v23, 0.0  ;;  %v5042_v13 = vld [vmem:[#allocation8 + $0xa20] ss:$48 sps:$4 sm:$0xff]   ;;  %v5045_v14 = vld [vmem:[#allocation8 + $0xa28] ss:$48 sps:$4 sm:$0xff]  }
 0x199   :  { %v5050_v15 = vld [vmem:[#allocation8 + $0xa84] ss:$48 sps:$4 sm:$0xff]   ;;  %v5053_v16 = vld [vmem:[#allocation8 + $0xa8c] ss:$48 sps:$4 sm:$0xff]   ;;  %v5048_v17 = vld [vmem:[#allocation8 + $0xa80] ss:$48 sps:$4 sm:$0xff]  }
 0x19a   :  { %v5749_v28 = vpack.c.bf16 %v952_v1, %v952_v1  ;;  %3293 = vmatprep.mubr.bf16.mxu0 %v5745_v24  ;;  %3375 = vmatprep.mubr.bf16.mxu1 %v5745_v24  ;;  %v5051_v18 = vld [vmem:[#allocation8 + $0xa88] ss:$48 sps:$4 sm:$0xff]   ;;  %v5056_v19 = vld [vmem:[#allocation8 + $0xae4] ss:$48 sps:$4 sm:$0xff]   ;;  %v5059_v21 = vld [vmem:[#allocation8 + $0xaec] ss:$48 sps:$4 sm:$0xff]  }
 0x19b   :  { %3294 = vmatmul.mubr.bf16.vlgmr.msra.gmra.mrb[12].mxu0 %v5747_v27  ;;  %3376 = vmatmul.mubr.bf16.vlgmr.msra.gmra.mrb[12].mxu1 %v5747_v27  ;;  %v5054_v22 = vld [vmem:[#allocation8 + $0xae0] ss:$48 sps:$4 sm:$0xff]   ;;  %v5057_v23 = vld [vmem:[#allocation8 + $0xae8] ss:$48 sps:$4 sm:$0xff]   ;;  %v5062_v1 = vld [vmem:[#allocation8 + $0xb44] ss:$48 sps:$4 sm:$0xff]  }
 0x19c   :  { %3303 = vmatpush1.bf16.msra.mxu0 %v4976_v25  ;;  %3385 = vmatpush1.bf16.msra.mxu1 %v4979_v26  ;;  %v5065_v25 = vld [vmem:[#allocation8 + $0xb4c] ss:$48 sps:$4 sm:$0xff]   ;;  %v5060_v26 = vld [vmem:[#allocation8 + $0xb40] ss:$48 sps:$4 sm:$0xff]  }
 0x19d   :  { %3334 = vmatprep.mubr.bf16.mxu0 %v5749_v28  ;;  %3416 = vmatprep.mubr.bf16.mxu1 %v5749_v28 }
 0x19e   :  { %3304 = vmatprep.subr.bf16.mxu0 %v4984_v29  ;;  %3386 = vmatprep.subr.bf16.mxu1 %v4987_v30  ;;  %v5063_v29 = vld [vmem:[#allocation8 + $0xb48] ss:$48 sps:$4 sm:$0xff]   ;;  %v5068_v30 = vld [vmem:[#allocation8 + $0xba4] ss:$48 sps:$4 sm:$0xff]  }
 0x1a0   :  { %3305 = vmatpush1.bf16.msra.mxu0 %v4982_v31  ;;  %3387 = vmatpush1.bf16.msra.mxu1 %v4985_v32  ;;  %v5071_v31 = vld [vmem:[#allocation8 + $0xbac] ss:$48 sps:$4 sm:$0xff]   ;;  %v5066_v32 = vld [vmem:[#allocation8 + $0xba0] ss:$48 sps:$4 sm:$0xff]  }
 0x1a1   :  { %3306 = vmatprep.subr.bf16.mxu0 %v4990_v33  ;;  %3388 = vmatprep.subr.bf16.mxu1 %v4993_v34  ;;  %v5069_v33 = vld [vmem:[#allocation8 + $0xba8] ss:$48 sps:$4 sm:$0xff]   ;;  %v951_v34 = vmax.f32 %v5743_v20, 0.0  ;;  %v5078_v20 = vld [vmem:[#allocation8 + $0x70] ss:$48 sps:$4 sm:$0xff]  }
 0x1a4   :  { %3307 = vmatpush1.bf16.msra.mxu0 %v4988_v35  ;;  %3389 = vmatpush1.bf16.msra.mxu1 %v4991_v37  ;;  %v5074_v35 = vld [vmem:[#allocation8 + $0x14] ss:$48 sps:$4 sm:$0xff]   ;;  %v5077_v37 = vld [vmem:[#allocation8 + $0x1c] ss:$48 sps:$4 sm:$0xff]  }
 0x1a5   :  { %3308 = vmatprep.subr.bf16.mxu0 %v4996_v38  ;;  %3390 = vmatprep.subr.bf16.mxu1 %v4999_v39  ;;  %v5072_v38 = vld [vmem:[#allocation8 + $0x10] ss:$48 sps:$4 sm:$0xff]   ;;  %v5758_v39 = vpack.c.bf16 %v951_v34, %v951_v34 }
 0x1a6   :  { %v5150_v34 = vld [vmem:[#allocation8 + $0x4f0] ss:$48 sps:$4 sm:$0xff]  }
 0x1a8   :  { %3309 = vmatpush1.bf16.msra.mxu0 %v4994_v40  ;;  %3391 = vmatpush1.bf16.msra.mxu1 %v4997_v41  ;;  %v5075_v40 = vld [vmem:[#allocation8 + $0x18] ss:$48 sps:$4 sm:$0xff]   ;;  %v5080_v41 = vld [vmem:[#allocation8 + $0x74] ss:$48 sps:$4 sm:$0xff]  }
 0x1a9   :  { %3310 = vmatprep.subr.bf16.mxu0 %v5002_v42  ;;  %3392 = vmatprep.subr.bf16.mxu1 %v5005_v43  ;;  %v5083_v42 = vld [vmem:[#allocation8 + $0x7c] ss:$48 sps:$4 sm:$0xff]   ;;  %v5081_v43 = vld [vmem:[#allocation8 + $0x78] ss:$48 sps:$4 sm:$0xff]  }
 0x1ac   :  { %3311 = vmatpush1.bf16.msra.mxu0 %v5000_v44  ;;  %3393 = vmatpush1.bf16.msra.mxu1 %v5003_v45  ;;  %v5086_v44 = vld [vmem:[#allocation8 + $0xd4] ss:$48 sps:$4 sm:$0xff]   ;;  %v5089_v45 = vld [vmem:[#allocation8 + $0xdc] ss:$48 sps:$4 sm:$0xff]  }
 0x1ad   :  { %3312 = vmatprep.subr.bf16.mxu0 %v5008_v46  ;;  %3394 = vmatprep.subr.bf16.mxu1 %v5011_v47  ;;  %v5084_v46 = vld [vmem:[#allocation8 + $0xd0] ss:$48 sps:$4 sm:$0xff]   ;;  %v5087_v47 = vld [vmem:[#allocation8 + $0xd8] ss:$48 sps:$4 sm:$0xff]  }
 0x1b0   :  { %3313 = vmatpush1.bf16.msra.mxu0 %v5006_v48  ;;  %3395 = vmatpush1.bf16.msra.mxu1 %v5009_v36  ;;  %v5092_v48 = vld [vmem:[#allocation8 + $0x134] ss:$48 sps:$4 sm:$0xff]   ;;  %v5095_v36 = vld [vmem:[#allocation8 + $0x13c] ss:$48 sps:$4 sm:$0xff]  }
 0x1b1   :  { %3314 = vmatprep.subr.bf16.mxu0 %v5014_v49  ;;  %3396 = vmatprep.subr.bf16.mxu1 %v5017_v50  ;;  %v5090_v49 = vld [vmem:[#allocation8 + $0x130] ss:$48 sps:$4 sm:$0xff]   ;;  %v5093_v50 = vld [vmem:[#allocation8 + $0x138] ss:$48 sps:$4 sm:$0xff]  }
 0x1b4   :  { %3315 = vmatpush1.bf16.msra.mxu0 %v5012_v51  ;;  %3397 = vmatpush1.bf16.msra.mxu1 %v5015_v52  ;;  %v5098_v51 = vld [vmem:[#allocation8 + $0x194] ss:$48 sps:$4 sm:$0xff]   ;;  %v5101_v52 = vld [vmem:[#allocation8 + $0x19c] ss:$48 sps:$4 sm:$0xff]  }
 0x1b5   :  { %3316 = vmatprep.subr.bf16.mxu0 %v5020_v53  ;;  %3398 = vmatprep.subr.bf16.mxu1 %v5023_v54  ;;  %v5096_v53 = vld [vmem:[#allocation8 + $0x190] ss:$48 sps:$4 sm:$0xff]   ;;  %v5099_v54 = vld [vmem:[#allocation8 + $0x198] ss:$48 sps:$4 sm:$0xff]  }
 0x1b8   :  { %3317 = vmatpush1.bf16.msra.mxu0 %v5018_v55  ;;  %3399 = vmatpush1.bf16.msra.mxu1 %v5021_v56  ;;  %v5104_v55 = vld [vmem:[#allocation8 + $0x1f4] ss:$48 sps:$4 sm:$0xff]   ;;  %v5107_v56 = vld [vmem:[#allocation8 + $0x1fc] ss:$48 sps:$4 sm:$0xff]  }
 0x1b9   :  { %3318 = vmatprep.subr.bf16.mxu0 %v5026_v57  ;;  %3400 = vmatprep.subr.bf16.mxu1 %v5029_v58  ;;  %v5102_v57 = vld [vmem:[#allocation8 + $0x1f0] ss:$48 sps:$4 sm:$0xff]   ;;  %v5105_v58 = vld [vmem:[#allocation8 + $0x1f8] ss:$48 sps:$4 sm:$0xff]  }
 0x1bc   :  { %3319 = vmatpush1.bf16.msra.mxu0 %v5024_v61  ;;  %3401 = vmatpush1.bf16.msra.mxu1 %v5027_v2  ;;  %v5110_v61 = vld [vmem:[#allocation8 + $0x254] ss:$48 sps:$4 sm:$0xff]   ;;  %v5113_v2 = vld [vmem:[#allocation8 + $0x25c] ss:$48 sps:$4 sm:$0xff]  }
 0x1bd   :  { %3320 = vmatprep.subr.bf16.mxu0 %v5032_v3  ;;  %3402 = vmatprep.subr.bf16.mxu1 %v5035_v4  ;;  %v5108_v3 = vld [vmem:[#allocation8 + $0x250] ss:$48 sps:$4 sm:$0xff]   ;;  %v5111_v4 = vld [vmem:[#allocation8 + $0x258] ss:$48 sps:$4 sm:$0xff]  }
 0x1c0   :  { %3321 = vmatpush1.bf16.msra.mxu0 %v5030_v5  ;;  %3403 = vmatpush1.bf16.msra.mxu1 %v5033_v6  ;;  %v5116_v5 = vld [vmem:[#allocation8 + $0x2b4] ss:$48 sps:$4 sm:$0xff]   ;;  %v5119_v6 = vld [vmem:[#allocation8 + $0x2bc] ss:$48 sps:$4 sm:$0xff]  }
 0x1c1   :  { %3322 = vmatprep.subr.bf16.mxu0 %v5038_v7  ;;  %3404 = vmatprep.subr.bf16.mxu1 %v5041_v8  ;;  %v5114_v7 = vld [vmem:[#allocation8 + $0x2b0] ss:$48 sps:$4 sm:$0xff]   ;;  %v5117_v8 = vld [vmem:[#allocation8 + $0x2b8] ss:$48 sps:$4 sm:$0xff]  }
 0x1c4   :  { %3323 = vmatpush1.bf16.msra.mxu0 %v5036_v9  ;;  %3405 = vmatpush1.bf16.msra.mxu1 %v5039_v10  ;;  %v5122_v9 = vld [vmem:[#allocation8 + $0x314] ss:$48 sps:$4 sm:$0xff]   ;;  %v5125_v10 = vld [vmem:[#allocation8 + $0x31c] ss:$48 sps:$4 sm:$0xff]  }
 0x1c5   :  { %3324 = vmatprep.subr.bf16.mxu0 %v5044_v11  ;;  %3406 = vmatprep.subr.bf16.mxu1 %v5047_v12  ;;  %v5120_v11 = vld [vmem:[#allocation8 + $0x310] ss:$48 sps:$4 sm:$0xff]   ;;  %v5123_v12 = vld [vmem:[#allocation8 + $0x318] ss:$48 sps:$4 sm:$0xff]  }
 0x1c8   :  { %3325 = vmatpush1.bf16.msra.mxu0 %v5042_v13  ;;  %3407 = vmatpush1.bf16.msra.mxu1 %v5045_v14  ;;  %v5128_v13 = vld [vmem:[#allocation8 + $0x374] ss:$48 sps:$4 sm:$0xff]   ;;  %v5131_v14 = vld [vmem:[#allocation8 + $0x37c] ss:$48 sps:$4 sm:$0xff]  }
 0x1c9   :  { %3326 = vmatprep.subr.bf16.mxu0 %v5050_v15  ;;  %3408 = vmatprep.subr.bf16.mxu1 %v5053_v16  ;;  %v5126_v15 = vld [vmem:[#allocation8 + $0x370] ss:$48 sps:$4 sm:$0xff]   ;;  %v5129_v16 = vld [vmem:[#allocation8 + $0x378] ss:$48 sps:$4 sm:$0xff]  }
 0x1cc   :  { %3327 = vmatpush1.bf16.msra.mxu0 %v5048_v17  ;;  %3409 = vmatpush1.bf16.msra.mxu1 %v5051_v18  ;;  %v5134_v17 = vld [vmem:[#allocation8 + $0x3d4] ss:$48 sps:$4 sm:$0xff]   ;;  %v5137_v18 = vld [vmem:[#allocation8 + $0x3dc] ss:$48 sps:$4 sm:$0xff]  }
 0x1cd   :  { %3328 = vmatprep.subr.bf16.mxu0 %v5056_v19  ;;  %3410 = vmatprep.subr.bf16.mxu1 %v5059_v21  ;;  %v5132_v19 = vld [vmem:[#allocation8 + $0x3d0] ss:$48 sps:$4 sm:$0xff]   ;;  %v5135_v21 = vld [vmem:[#allocation8 + $0x3d8] ss:$48 sps:$4 sm:$0xff]  }
 0x1d0   :  { %3329 = vmatpush1.bf16.msra.mxu0 %v5054_v22  ;;  %3411 = vmatpush1.bf16.msra.mxu1 %v5057_v23  ;;  %v5140_v22 = vld [vmem:[#allocation8 + $0x434] ss:$48 sps:$4 sm:$0xff]   ;;  %v5143_v23 = vld [vmem:[#allocation8 + $0x43c] ss:$48 sps:$4 sm:$0xff]  }
 0x1d1   :  { %3330 = vmatprep.subr.bf16.mxu0 %v5062_v1  ;;  %3412 = vmatprep.subr.bf16.mxu1 %v5065_v25  ;;  %v5138_v1 = vld [vmem:[#allocation8 + $0x430] ss:$48 sps:$4 sm:$0xff]   ;;  %v5141_v25 = vld [vmem:[#allocation8 + $0x438] ss:$48 sps:$4 sm:$0xff]  }
 0x1d4   :  { %3331 = vmatpush1.bf16.msra.mxu0 %v5060_v26  ;;  %3413 = vmatpush1.bf16.msra.mxu1 %v5063_v29  ;;  %v5146_v26 = vld [vmem:[#allocation8 + $0x494] ss:$48 sps:$4 sm:$0xff]   ;;  %v5149_v29 = vld [vmem:[#allocation8 + $0x49c] ss:$48 sps:$4 sm:$0xff]  }
 0x1d5   :  { %3332 = vmatprep.subr.bf16.mxu0 %v5068_v30  ;;  %3414 = vmatprep.subr.bf16.mxu1 %v5071_v31  ;;  %v5144_v30 = vld [vmem:[#allocation8 + $0x490] ss:$48 sps:$4 sm:$0xff]   ;;  %v5147_v31 = vld [vmem:[#allocation8 + $0x498] ss:$48 sps:$4 sm:$0xff]  }
 0x1d8   :  { %3333 = vmatpush1.bf16.msra.mxu0 %v5066_v32  ;;  %3415 = vmatpush1.bf16.msra.mxu1 %v5069_v33  ;;  %v5152_v32 = vld [vmem:[#allocation8 + $0x4f4] ss:$48 sps:$4 sm:$0xff]   ;;  %v5155_v33 = vld [vmem:[#allocation8 + $0x4fc] ss:$48 sps:$4 sm:$0xff]  }
 0x1d9   :  { %3425 = vmatprep.subr.bf16.mxu0 %v5074_v35  ;;  %3507 = vmatprep.subr.bf16.mxu1 %v5077_v37  ;;  %v5153_v35 = vld [vmem:[#allocation8 + $0x4f8] ss:$48 sps:$4 sm:$0xff]   ;;  %v5158_v37 = vld [vmem:[#allocation8 + $0x554] ss:$48 sps:$4 sm:$0xff]  }
 0x1db   :  { %3335 = vmatmul.mubr.bf16.vlgmr.msra.gmra.mrb[12].mxu0 %v5758_v39  ;;  %3417 = vmatmul.mubr.bf16.vlgmr.msra.gmra.mrb[12].mxu1 %v5758_v39 }
 0x1dc   :  { %3426 = vmatpush1.bf16.msra.mxu0 %v5072_v38  ;;  %3457 = vmatprep.mubr.bf16.mxu0 %v5745_v24  ;;  %v5161_v38 = vld [vmem:[#allocation8 + $0x55c] ss:$48 sps:$4 sm:$0xff]  }
 0x1dd   :  { %3508 = vmatpush1.bf16.msra.mxu1 %v5075_v40  ;;  %3539 = vmatprep.mubr.bf16.mxu1 %v5745_v24  ;;  %v5156_v40 = vld [vmem:[#allocation8 + $0x550] ss:$48 sps:$4 sm:$0xff]  }
 0x1de   :  { %3427 = vmatprep.subr.bf16.mxu0 %v5080_v41  ;;  %3509 = vmatprep.subr.bf16.mxu1 %v5083_v42  ;;  %v5159_v41 = vld [vmem:[#allocation8 + $0x558] ss:$48 sps:$4 sm:$0xff]   ;;  %v5164_v42 = vld [vmem:[#allocation8 + $0x5b4] ss:$48 sps:$4 sm:$0xff]  }
 0x1e0   :  { %3428 = vmatpush1.bf16.msra.mxu0 %v5078_v20  ;;  %v5167_v20 = vld [vmem:[#allocation8 + $0x5bc] ss:$48 sps:$4 sm:$0xff]  }
 0x1e1   :  { %3510 = vmatpush1.bf16.msra.mxu1 %v5081_v43  ;;  %3429 = vmatprep.subr.bf16.mxu0 %v5086_v44  ;;  %v5162_v43 = vld [vmem:[#allocation8 + $0x5b0] ss:$48 sps:$4 sm:$0xff]   ;;  %v5165_v44 = vld [vmem:[#allocation8 + $0x5b8] ss:$48 sps:$4 sm:$0xff]  }
 0x1e2   :  { %3511 = vmatprep.subr.bf16.mxu1 %v5089_v45  ;;  %v5170_v45 = vld [vmem:[#allocation8 + $0x614] ss:$48 sps:$4 sm:$0xff]  }
 0x1e4   :  { %3430 = vmatpush1.bf16.msra.mxu0 %v5084_v46  ;;  %v5173_v46 = vld [vmem:[#allocation8 + $0x61c] ss:$48 sps:$4 sm:$0xff]  }
 0x1e5   :  { %3512 = vmatpush1.bf16.msra.mxu1 %v5087_v47  ;;  %3431 = vmatprep.subr.bf16.mxu0 %v5092_v48  ;;  %v5168_v47 = vld [vmem:[#allocation8 + $0x610] ss:$48 sps:$4 sm:$0xff]   ;;  %v5171_v48 = vld [vmem:[#allocation8 + $0x618] ss:$48 sps:$4 sm:$0xff]  }
 0x1e6   :  { %3513 = vmatprep.subr.bf16.mxu1 %v5095_v36  ;;  %v5176_v36 = vld [vmem:[#allocation8 + $0x674] ss:$48 sps:$4 sm:$0xff]  }
 0x1e8   :  { %3432 = vmatpush1.bf16.msra.mxu0 %v5090_v49  ;;  %v5179_v49 = vld [vmem:[#allocation8 + $0x67c] ss:$48 sps:$4 sm:$0xff]  }
 0x1e9   :  { %3514 = vmatpush1.bf16.msra.mxu1 %v5093_v50  ;;  %3433 = vmatprep.subr.bf16.mxu0 %v5098_v51  ;;  %v5174_v50 = vld [vmem:[#allocation8 + $0x670] ss:$48 sps:$4 sm:$0xff]   ;;  %v5177_v51 = vld [vmem:[#allocation8 + $0x678] ss:$48 sps:$4 sm:$0xff]  }
 0x1ea   :  { %3515 = vmatprep.subr.bf16.mxu1 %v5101_v52  ;;  %v5182_v52 = vld [vmem:[#allocation8 + $0x6d4] ss:$48 sps:$4 sm:$0xff]  }
 0x1ec   :  { %3434 = vmatpush1.bf16.msra.mxu0 %v5096_v53  ;;  %v5185_v53 = vld [vmem:[#allocation8 + $0x6dc] ss:$48 sps:$4 sm:$0xff]  }
 0x1ed   :  { %3516 = vmatpush1.bf16.msra.mxu1 %v5099_v54  ;;  %3435 = vmatprep.subr.bf16.mxu0 %v5104_v55  ;;  %v5180_v54 = vld [vmem:[#allocation8 + $0x6d0] ss:$48 sps:$4 sm:$0xff]   ;;  %v5183_v55 = vld [vmem:[#allocation8 + $0x6d8] ss:$48 sps:$4 sm:$0xff]  }
 0x1ee   :  { %3517 = vmatprep.subr.bf16.mxu1 %v5107_v56  ;;  %v5188_v56 = vld [vmem:[#allocation8 + $0x734] ss:$48 sps:$4 sm:$0xff]  }
 0x1f0   :  { %3436 = vmatpush1.bf16.msra.mxu0 %v5102_v57  ;;  %v5191_v57 = vld [vmem:[#allocation8 + $0x73c] ss:$48 sps:$4 sm:$0xff]  }
 0x1f1   :  { %3518 = vmatpush1.bf16.msra.mxu1 %v5105_v58  ;;  %3437 = vmatprep.subr.bf16.mxu0 %v5110_v61  ;;  %v5186_v58 = vld [vmem:[#allocation8 + $0x730] ss:$48 sps:$4 sm:$0xff]   ;;  %v5189_v61 = vld [vmem:[#allocation8 + $0x738] ss:$48 sps:$4 sm:$0xff]  }
 0x1f2   :  { %3519 = vmatprep.subr.bf16.mxu1 %v5113_v2  ;;  %v5194_v2 = vld [vmem:[#allocation8 + $0x794] ss:$48 sps:$4 sm:$0xff]  }
 0x1f4   :  { %3438 = vmatpush1.bf16.msra.mxu0 %v5108_v3  ;;  %v5197_v3 = vld [vmem:[#allocation8 + $0x79c] ss:$48 sps:$4 sm:$0xff]  }
 0x1f5   :  { %3520 = vmatpush1.bf16.msra.mxu1 %v5111_v4  ;;  %3439 = vmatprep.subr.bf16.mxu0 %v5116_v5  ;;  %v5192_v4 = vld [vmem:[#allocation8 + $0x790] ss:$48 sps:$4 sm:$0xff]   ;;  %v5195_v5 = vld [vmem:[#allocation8 + $0x798] ss:$48 sps:$4 sm:$0xff]  }
 0x1f6   :  { %3521 = vmatprep.subr.bf16.mxu1 %v5119_v6  ;;  %v5200_v6 = vld [vmem:[#allocation8 + $0x7f4] ss:$48 sps:$4 sm:$0xff]  }
 0x1f8   :  { %3440 = vmatpush1.bf16.msra.mxu0 %v5114_v7  ;;  %v5203_v7 = vld [vmem:[#allocation8 + $0x7fc] ss:$48 sps:$4 sm:$0xff]  }
 0x1f9   :  { %3522 = vmatpush1.bf16.msra.mxu1 %v5117_v8  ;;  %3441 = vmatprep.subr.bf16.mxu0 %v5122_v9  ;;  %v5198_v8 = vld [vmem:[#allocation8 + $0x7f0] ss:$48 sps:$4 sm:$0xff]   ;;  %v5201_v9 = vld [vmem:[#allocation8 + $0x7f8] ss:$48 sps:$4 sm:$0xff]  }
 0x1fa   :  { %3523 = vmatprep.subr.bf16.mxu1 %v5125_v10  ;;  %v5206_v10 = vld [vmem:[#allocation8 + $0x854] ss:$48 sps:$4 sm:$0xff]  }
 0x1fc   :  { %3442 = vmatpush1.bf16.msra.mxu0 %v5120_v11  ;;  %v5209_v11 = vld [vmem:[#allocation8 + $0x85c] ss:$48 sps:$4 sm:$0xff]  }
 0x1fd   :  { %3524 = vmatpush1.bf16.msra.mxu1 %v5123_v12  ;;  %3443 = vmatprep.subr.bf16.mxu0 %v5128_v13  ;;  %v5204_v12 = vld [vmem:[#allocation8 + $0x850] ss:$48 sps:$4 sm:$0xff]   ;;  %v5207_v13 = vld [vmem:[#allocation8 + $0x858] ss:$48 sps:$4 sm:$0xff]  }
 0x1fe   :  { %3525 = vmatprep.subr.bf16.mxu1 %v5131_v14  ;;  %v5212_v14 = vld [vmem:[#allocation8 + $0x8b4] ss:$48 sps:$4 sm:$0xff]  }
 0x200   :  { %3444 = vmatpush1.bf16.msra.mxu0 %v5126_v15  ;;  %v5215_v15 = vld [vmem:[#allocation8 + $0x8bc] ss:$48 sps:$4 sm:$0xff]  }
 0x201   :  { %3526 = vmatpush1.bf16.msra.mxu1 %v5129_v16  ;;  %3445 = vmatprep.subr.bf16.mxu0 %v5134_v17  ;;  %v5210_v16 = vld [vmem:[#allocation8 + $0x8b0] ss:$48 sps:$4 sm:$0xff]   ;;  %v5213_v17 = vld [vmem:[#allocation8 + $0x8b8] ss:$48 sps:$4 sm:$0xff]  }
 0x202   :  { %3527 = vmatprep.subr.bf16.mxu1 %v5137_v18  ;;  %v5218_v18 = vld [vmem:[#allocation8 + $0x914] ss:$48 sps:$4 sm:$0xff]  }
 0x204   :  { %3446 = vmatpush1.bf16.msra.mxu0 %v5132_v19  ;;  %v5221_v19 = vld [vmem:[#allocation8 + $0x91c] ss:$48 sps:$4 sm:$0xff]  }
 0x205   :  { %3528 = vmatpush1.bf16.msra.mxu1 %v5135_v21  ;;  %3447 = vmatprep.subr.bf16.mxu0 %v5140_v22  ;;  %v5216_v21 = vld [vmem:[#allocation8 + $0x910] ss:$48 sps:$4 sm:$0xff]   ;;  %v5219_v22 = vld [vmem:[#allocation8 + $0x918] ss:$48 sps:$4 sm:$0xff]  }
 0x206   :  { %3529 = vmatprep.subr.bf16.mxu1 %v5143_v23  ;;  %v5224_v23 = vld [vmem:[#allocation8 + $0x974] ss:$48 sps:$4 sm:$0xff]  }
 0x208   :  { %3448 = vmatpush1.bf16.msra.mxu0 %v5138_v1  ;;  %v5227_v1 = vld [vmem:[#allocation8 + $0x97c] ss:$48 sps:$4 sm:$0xff]  }
 0x209   :  { %3530 = vmatpush1.bf16.msra.mxu1 %v5141_v25  ;;  %3449 = vmatprep.subr.bf16.mxu0 %v5146_v26  ;;  %v5222_v25 = vld [vmem:[#allocation8 + $0x970] ss:$48 sps:$4 sm:$0xff]   ;;  %v5225_v26 = vld [vmem:[#allocation8 + $0x978] ss:$48 sps:$4 sm:$0xff]  }
 0x20a   :  { %3531 = vmatprep.subr.bf16.mxu1 %v5149_v29  ;;  %v5230_v29 = vld [vmem:[#allocation8 + $0x9d4] ss:$48 sps:$4 sm:$0xff]  }
 0x20c   :  { %3450 = vmatpush1.bf16.msra.mxu0 %v5144_v30  ;;  %v5233_v30 = vld [vmem:[#allocation8 + $0x9dc] ss:$48 sps:$4 sm:$0xff]  }
 0x20d   :  { %3532 = vmatpush1.bf16.msra.mxu1 %v5147_v31  ;;  %3451 = vmatprep.subr.bf16.mxu0 %v5152_v32  ;;  %v5228_v31 = vld [vmem:[#allocation8 + $0x9d0] ss:$48 sps:$4 sm:$0xff]   ;;  %v5231_v32 = vld [vmem:[#allocation8 + $0x9d8] ss:$48 sps:$4 sm:$0xff]  }
 0x20e   :  { %3533 = vmatprep.subr.bf16.mxu1 %v5155_v33  ;;  %v5236_v33 = vld [vmem:[#allocation8 + $0xa34] ss:$48 sps:$4 sm:$0xff]  }
 0x210   :  { %3452 = vmatpush1.bf16.msra.mxu0 %v5150_v34  ;;  %v5239_v34 = vld [vmem:[#allocation8 + $0xa3c] ss:$48 sps:$4 sm:$0xff]  }
 0x211   :  { %3534 = vmatpush1.bf16.msra.mxu1 %v5153_v35  ;;  %3453 = vmatprep.subr.bf16.mxu0 %v5158_v37  ;;  %v5234_v35 = vld [vmem:[#allocation8 + $0xa30] ss:$48 sps:$4 sm:$0xff]   ;;  %v5237_v37 = vld [vmem:[#allocation8 + $0xa38] ss:$48 sps:$4 sm:$0xff]  }
 0x212   :  { %3535 = vmatprep.subr.bf16.mxu1 %v5161_v38  ;;  %v5242_v38 = vld [vmem:[#allocation8 + $0xa94] ss:$48 sps:$4 sm:$0xff]  }
 0x214   :  { %3454 = vmatpush1.bf16.msra.mxu0 %v5156_v40  ;;  %v5245_v40 = vld [vmem:[#allocation8 + $0xa9c] ss:$48 sps:$4 sm:$0xff]  }
 0x215   :  { %3536 = vmatpush1.bf16.msra.mxu1 %v5159_v41  ;;  %3455 = vmatprep.subr.bf16.mxu0 %v5164_v42  ;;  %v5240_v41 = vld [vmem:[#allocation8 + $0xa90] ss:$48 sps:$4 sm:$0xff]   ;;  %v5243_v42 = vld [vmem:[#allocation8 + $0xa98] ss:$48 sps:$4 sm:$0xff]  }
 0x216   :  { %3537 = vmatprep.subr.bf16.mxu1 %v5167_v20  ;;  %v5248_v20 = vld [vmem:[#allocation8 + $0xaf4] ss:$48 sps:$4 sm:$0xff]  }
 0x218   :  { %3456 = vmatpush1.bf16.msra.mxu0 %v5162_v43  ;;  %v5251_v43 = vld [vmem:[#allocation8 + $0xafc] ss:$48 sps:$4 sm:$0xff]  }
 0x219   :  { %3538 = vmatpush1.bf16.msra.mxu1 %v5165_v44  ;;  %3466 = vmatprep.subr.bf16.mxu0 %v5170_v45  ;;  %v5246_v44 = vld [vmem:[#allocation8 + $0xaf0] ss:$48 sps:$4 sm:$0xff]   ;;  %v5249_v45 = vld [vmem:[#allocation8 + $0xaf8] ss:$48 sps:$4 sm:$0xff]  }
 0x21a   :  { %3548 = vmatprep.subr.bf16.mxu1 %v5173_v46  ;;  %v5254_v46 = vld [vmem:[#allocation8 + $0xb54] ss:$48 sps:$4 sm:$0xff]  }
 0x21b   :  { %3458 = vmatmul.mubr.bf16.vlgmr.msra.gmra.mrb[16].mxu0 %v5747_v27 }
 0x21c   :  { %3540 = vmatmul.mubr.bf16.vlgmr.msra.gmra.mrb[16].mxu1 %v5747_v27  ;;  %3467 = vmatpush1.bf16.msra.mxu0 %v5168_v47  ;;  %v5257_v47 = vld [vmem:[#allocation8 + $0xb5c] ss:$48 sps:$4 sm:$0xff]  }
 0x21d   :  { %3498 = vmatprep.mubr.bf16.mxu0 %v5749_v28  ;;  %3549 = vmatpush1.bf16.msra.mxu1 %v5171_v48  ;;  %v5252_v48 = vld [vmem:[#allocation8 + $0xb50] ss:$48 sps:$4 sm:$0xff]  }
 0x21e   :  { %3580 = vmatprep.mubr.bf16.mxu1 %v5749_v28  ;;  %3468 = vmatprep.subr.bf16.mxu0 %v5176_v36  ;;  %v5255_v36 = vld [vmem:[#allocation8 + $0xb58] ss:$48 sps:$4 sm:$0xff]  }
 0x21f   :  { %3550 = vmatprep.subr.bf16.mxu1 %v5179_v49  ;;  %v5260_v49 = vld [vmem:[#allocation8 + $0xbb4] ss:$48 sps:$4 sm:$0xff]  }
 0x220   :  { %3469 = vmatpush1.bf16.msra.mxu0 %v5174_v50  ;;  %v5263_v50 = vld [vmem:[#allocation8 + $0xbbc] ss:$48 sps:$4 sm:$0xff]  }
 0x221   :  { %3551 = vmatpush1.bf16.msra.mxu1 %v5177_v51  ;;  %3470 = vmatprep.subr.bf16.mxu0 %v5182_v52  ;;  %v5258_v51 = vld [vmem:[#allocation8 + $0xbb0] ss:$48 sps:$4 sm:$0xff]   ;;  %v5261_v52 = vld [vmem:[#allocation8 + $0xbb8] ss:$48 sps:$4 sm:$0xff]  }
 0x222   :  { %3552 = vmatprep.subr.bf16.mxu1 %v5185_v53  ;;  %v5266_v53 = vld [vmem:[#allocation8 + $0x24] ss:$48 sps:$4 sm:$0xff]  }
 0x224   :  { %3471 = vmatpush1.bf16.msra.mxu0 %v5180_v54  ;;  %v5269_v54 = vld [vmem:[#allocation8 + $0x2c] ss:$48 sps:$4 sm:$0xff]  }
 0x225   :  { %3553 = vmatpush1.bf16.msra.mxu1 %v5183_v55  ;;  %3472 = vmatprep.subr.bf16.mxu0 %v5188_v56  ;;  %v5264_v55 = vld [vmem:[#allocation8 + $0x20] ss:$48 sps:$4 sm:$0xff]   ;;  %v5267_v56 = vld [vmem:[#allocation8 + $0x28] ss:$48 sps:$4 sm:$0xff]  }
 0x226   :  { %3554 = vmatprep.subr.bf16.mxu1 %v5191_v57  ;;  %v5272_v57 = vld [vmem:[#allocation8 + $0x84] ss:$48 sps:$4 sm:$0xff]  }
 0x228   :  { %3473 = vmatpush1.bf16.msra.mxu0 %v5186_v58  ;;  %v5275_v58 = vld [vmem:[#allocation8 + $0x8c] ss:$48 sps:$4 sm:$0xff]  }
 0x229   :  { %3555 = vmatpush1.bf16.msra.mxu1 %v5189_v61  ;;  %3474 = vmatprep.subr.bf16.mxu0 %v5194_v2  ;;  %v5270_v61 = vld [vmem:[#allocation8 + $0x80] ss:$48 sps:$4 sm:$0xff]   ;;  %v5273_v2 = vld [vmem:[#allocation8 + $0x88] ss:$48 sps:$4 sm:$0xff]  }
 0x22a   :  { %3556 = vmatprep.subr.bf16.mxu1 %v5197_v3  ;;  %v5278_v3 = vld [vmem:[#allocation8 + $0xe4] ss:$48 sps:$4 sm:$0xff]  }
 0x22c   :  { %3475 = vmatpush1.bf16.msra.mxu0 %v5192_v4  ;;  %v5281_v4 = vld [vmem:[#allocation8 + $0xec] ss:$48 sps:$4 sm:$0xff]  }
 0x22d   :  { %3557 = vmatpush1.bf16.msra.mxu1 %v5195_v5  ;;  %3476 = vmatprep.subr.bf16.mxu0 %v5200_v6  ;;  %v5276_v5 = vld [vmem:[#allocation8 + $0xe0] ss:$48 sps:$4 sm:$0xff]   ;;  %v5279_v6 = vld [vmem:[#allocation8 + $0xe8] ss:$48 sps:$4 sm:$0xff]  }
 0x22e   :  { %3558 = vmatprep.subr.bf16.mxu1 %v5203_v7  ;;  %v5284_v7 = vld [vmem:[#allocation8 + $0x144] ss:$48 sps:$4 sm:$0xff]  }
 0x230   :  { %3477 = vmatpush1.bf16.msra.mxu0 %v5198_v8  ;;  %v5287_v8 = vld [vmem:[#allocation8 + $0x14c] ss:$48 sps:$4 sm:$0xff]  }
 0x231   :  { %3559 = vmatpush1.bf16.msra.mxu1 %v5201_v9  ;;  %3478 = vmatprep.subr.bf16.mxu0 %v5206_v10  ;;  %v5282_v9 = vld [vmem:[#allocation8 + $0x140] ss:$48 sps:$4 sm:$0xff]   ;;  %v5285_v10 = vld [vmem:[#allocation8 + $0x148] ss:$48 sps:$4 sm:$0xff]  }
 0x232   :  { %3560 = vmatprep.subr.bf16.mxu1 %v5209_v11  ;;  %v5290_v11 = vld [vmem:[#allocation8 + $0x1a4] ss:$48 sps:$4 sm:$0xff]  }
 0x234   :  { %3479 = vmatpush1.bf16.msra.mxu0 %v5204_v12  ;;  %v5293_v12 = vld [vmem:[#allocation8 + $0x1ac] ss:$48 sps:$4 sm:$0xff]  }
 0x235   :  { %3561 = vmatpush1.bf16.msra.mxu1 %v5207_v13  ;;  %3480 = vmatprep.subr.bf16.mxu0 %v5212_v14  ;;  %v5291_v13 = vld [vmem:[#allocation8 + $0x1a8] ss:$48 sps:$4 sm:$0xff]   ;;  %v5296_v14 = vld [vmem:[#allocation8 + $0x204] ss:$48 sps:$4 sm:$0xff]  }
 0x236   :  { %3562 = vmatprep.subr.bf16.mxu1 %v5215_v15  ;;  %v5299_v15 = vld [vmem:[#allocation8 + $0x20c] ss:$48 sps:$4 sm:$0xff]  }
 0x238   :  { %3481 = vmatpush1.bf16.msra.mxu0 %v5210_v16  ;;  %v5294_v16 = vld [vmem:[#allocation8 + $0x200] ss:$48 sps:$4 sm:$0xff]  }
 0x239   :  { %3563 = vmatpush1.bf16.msra.mxu1 %v5213_v17  ;;  %3482 = vmatprep.subr.bf16.mxu0 %v5218_v18  ;;  %v5297_v17 = vld [vmem:[#allocation8 + $0x208] ss:$48 sps:$4 sm:$0xff]   ;;  %v5302_v18 = vld [vmem:[#allocation8 + $0x264] ss:$48 sps:$4 sm:$0xff]  }
 0x23a   :  { %3564 = vmatprep.subr.bf16.mxu1 %v5221_v19  ;;  %v5305_v19 = vld [vmem:[#allocation8 + $0x26c] ss:$48 sps:$4 sm:$0xff]  }
 0x23c   :  { %3483 = vmatpush1.bf16.msra.mxu0 %v5216_v21  ;;  %v5300_v21 = vld [vmem:[#allocation8 + $0x260] ss:$48 sps:$4 sm:$0xff]  }
 0x23d   :  { %3565 = vmatpush1.bf16.msra.mxu1 %v5219_v22  ;;  %3484 = vmatprep.subr.bf16.mxu0 %v5224_v23  ;;  %v5303_v22 = vld [vmem:[#allocation8 + $0x268] ss:$48 sps:$4 sm:$0xff]   ;;  %v5308_v23 = vld [vmem:[#allocation8 + $0x2c4] ss:$48 sps:$4 sm:$0xff]  }
 0x23e   :  { %3566 = vmatprep.subr.bf16.mxu1 %v5227_v1  ;;  %v5311_v1 = vld [vmem:[#allocation8 + $0x2cc] ss:$48 sps:$4 sm:$0xff]  }
 0x240   :  { %3485 = vmatpush1.bf16.msra.mxu0 %v5222_v25  ;;  %v5306_v25 = vld [vmem:[#allocation8 + $0x2c0] ss:$48 sps:$4 sm:$0xff]  }
 0x241   :  { %3567 = vmatpush1.bf16.msra.mxu1 %v5225_v26  ;;  %3486 = vmatprep.subr.bf16.mxu0 %v5230_v29  ;;  %v5309_v26 = vld [vmem:[#allocation8 + $0x2c8] ss:$48 sps:$4 sm:$0xff]   ;;  %v5314_v29 = vld [vmem:[#allocation8 + $0x324] ss:$48 sps:$4 sm:$0xff]  }
 0x242   :  { %3568 = vmatprep.subr.bf16.mxu1 %v5233_v30  ;;  %v5317_v30 = vld [vmem:[#allocation8 + $0x32c] ss:$48 sps:$4 sm:$0xff]  }
 0x244   :  { %3487 = vmatpush1.bf16.msra.mxu0 %v5228_v31  ;;  %v5312_v31 = vld [vmem:[#allocation8 + $0x320] ss:$48 sps:$4 sm:$0xff]  }
 0x245   :  { %3569 = vmatpush1.bf16.msra.mxu1 %v5231_v32  ;;  %3488 = vmatprep.subr.bf16.mxu0 %v5236_v33  ;;  %v5315_v32 = vld [vmem:[#allocation8 + $0x328] ss:$48 sps:$4 sm:$0xff]   ;;  %v5320_v33 = vld [vmem:[#allocation8 + $0x384] ss:$48 sps:$4 sm:$0xff]  }
 0x246   :  { %3570 = vmatprep.subr.bf16.mxu1 %v5239_v34  ;;  %v5323_v34 = vld [vmem:[#allocation8 + $0x38c] ss:$48 sps:$4 sm:$0xff]  }
 0x248   :  { %3489 = vmatpush1.bf16.msra.mxu0 %v5234_v35  ;;  %v5318_v35 = vld [vmem:[#allocation8 + $0x380] ss:$48 sps:$4 sm:$0xff]  }
 0x249   :  { %3571 = vmatpush1.bf16.msra.mxu1 %v5237_v37  ;;  %3490 = vmatprep.subr.bf16.mxu0 %v5242_v38  ;;  %v5321_v37 = vld [vmem:[#allocation8 + $0x388] ss:$48 sps:$4 sm:$0xff]   ;;  %v5326_v38 = vld [vmem:[#allocation8 + $0x3e4] ss:$48 sps:$4 sm:$0xff]  }
 0x24a   :  { %3572 = vmatprep.subr.bf16.mxu1 %v5245_v40  ;;  %v5329_v40 = vld [vmem:[#allocation8 + $0x3ec] ss:$48 sps:$4 sm:$0xff]  }
 0x24c   :  { %3491 = vmatpush1.bf16.msra.mxu0 %v5240_v41  ;;  %v5324_v41 = vld [vmem:[#allocation8 + $0x3e0] ss:$48 sps:$4 sm:$0xff]  }
 0x24d   :  { %3573 = vmatpush1.bf16.msra.mxu1 %v5243_v42  ;;  %3492 = vmatprep.subr.bf16.mxu0 %v5248_v20  ;;  %v5327_v42 = vld [vmem:[#allocation8 + $0x3e8] ss:$48 sps:$4 sm:$0xff]   ;;  %v5332_v20 = vld [vmem:[#allocation8 + $0x444] ss:$48 sps:$4 sm:$0xff]  }
 0x24e   :  { %3574 = vmatprep.subr.bf16.mxu1 %v5251_v43  ;;  %v5335_v43 = vld [vmem:[#allocation8 + $0x44c] ss:$48 sps:$4 sm:$0xff]  }
 0x250   :  { %3493 = vmatpush1.bf16.msra.mxu0 %v5246_v44  ;;  %v5330_v44 = vld [vmem:[#allocation8 + $0x440] ss:$48 sps:$4 sm:$0xff]  }
 0x251   :  { %3575 = vmatpush1.bf16.msra.mxu1 %v5249_v45  ;;  %3494 = vmatprep.subr.bf16.mxu0 %v5254_v46  ;;  %v5333_v45 = vld [vmem:[#allocation8 + $0x448] ss:$48 sps:$4 sm:$0xff]   ;;  %v5338_v46 = vld [vmem:[#allocation8 + $0x4a4] ss:$48 sps:$4 sm:$0xff]  }
 0x252   :  { %3576 = vmatprep.subr.bf16.mxu1 %v5257_v47  ;;  %v5341_v47 = vld [vmem:[#allocation8 + $0x4ac] ss:$48 sps:$4 sm:$0xff]  }
 0x254   :  { %3495 = vmatpush1.bf16.msra.mxu0 %v5252_v48  ;;  %v5336_v48 = vld [vmem:[#allocation8 + $0x4a0] ss:$48 sps:$4 sm:$0xff]  }
 0x255   :  { %3577 = vmatpush1.bf16.msra.mxu1 %v5255_v36  ;;  %3496 = vmatprep.subr.bf16.mxu0 %v5260_v49  ;;  %v5339_v36 = vld [vmem:[#allocation8 + $0x4a8] ss:$48 sps:$4 sm:$0xff]   ;;  %v5344_v49 = vld [vmem:[#allocation8 + $0x504] ss:$48 sps:$4 sm:$0xff]  }
 0x256   :  { %3578 = vmatprep.subr.bf16.mxu1 %v5263_v50  ;;  %v5347_v50 = vld [vmem:[#allocation8 + $0x50c] ss:$48 sps:$4 sm:$0xff]  }
 0x258   :  { %3497 = vmatpush1.bf16.msra.mxu0 %v5258_v51  ;;  %v5342_v51 = vld [vmem:[#allocation8 + $0x500] ss:$48 sps:$4 sm:$0xff]  }
 0x259   :  { %3579 = vmatpush1.bf16.msra.mxu1 %v5261_v52  ;;  %3589 = vmatprep.subr.bf16.mxu0 %v5266_v53  ;;  %v5345_v52 = vld [vmem:[#allocation8 + $0x508] ss:$48 sps:$4 sm:$0xff]   ;;  %v5350_v53 = vld [vmem:[#allocation8 + $0x564] ss:$48 sps:$4 sm:$0xff]  }
 0x25a   :  { %3671 = vmatprep.subr.bf16.mxu1 %v5269_v54  ;;  %v5353_v54 = vld [vmem:[#allocation8 + $0x56c] ss:$48 sps:$4 sm:$0xff]  }
 0x25b   :  { %3499 = vmatmul.mubr.bf16.vlgmr.msra.gmra.mrb[16].mxu0 %v5758_v39 }
 0x25c   :  { %3581 = vmatmul.mubr.bf16.vlgmr.msra.gmra.mrb[16].mxu1 %v5758_v39  ;;  %3590 = vmatpush1.bf16.msra.mxu0 %v5264_v55  ;;  %v5348_v55 = vld [vmem:[#allocation8 + $0x560] ss:$48 sps:$4 sm:$0xff]  }
 0x25d   :  { %3621 = vmatprep.mubr.bf16.mxu0 %v5745_v24  ;;  %3672 = vmatpush1.bf16.msra.mxu1 %v5267_v56  ;;  %v5351_v56 = vld [vmem:[#allocation8 + $0x568] ss:$48 sps:$4 sm:$0xff]  }
 0x25e   :  { %3703 = vmatprep.mubr.bf16.mxu1 %v5745_v24  ;;  %3591 = vmatprep.subr.bf16.mxu0 %v5272_v57  ;;  %v5288_v24 = vld [vmem:[#allocation8 + $0x1a0] ss:$48 sps:$4 sm:$0xff]   ;;  %v5356_v57 = vld [vmem:[#allocation8 + $0x5c4] ss:$48 sps:$4 sm:$0xff]  }
 0x25f   :  { %3673 = vmatprep.subr.bf16.mxu1 %v5275_v58  ;;  %v5359_v58 = vld [vmem:[#allocation8 + $0x5cc] ss:$48 sps:$4 sm:$0xff]  }
 0x260   :  { %3592 = vmatpush1.bf16.msra.mxu0 %v5270_v61  ;;  %v5354_v61 = vld [vmem:[#allocation8 + $0x5c0] ss:$48 sps:$4 sm:$0xff]  }
 0x261   :  { %3674 = vmatpush1.bf16.msra.mxu1 %v5273_v2  ;;  %3593 = vmatprep.subr.bf16.mxu0 %v5278_v3  ;;  %v5357_v2 = vld [vmem:[#allocation8 + $0x5c8] ss:$48 sps:$4 sm:$0xff]   ;;  %v5362_v3 = vld [vmem:[#allocation8 + $0x624] ss:$48 sps:$4 sm:$0xff]  }
 0x262   :  { %3675 = vmatprep.subr.bf16.mxu1 %v5281_v4  ;;  %v5365_v4 = vld [vmem:[#allocation8 + $0x62c] ss:$48 sps:$4 sm:$0xff]  }
 0x264   :  { %3594 = vmatpush1.bf16.msra.mxu0 %v5276_v5  ;;  %v5360_v5 = vld [vmem:[#allocation8 + $0x620] ss:$48 sps:$4 sm:$0xff]  }
 0x265   :  { %3676 = vmatpush1.bf16.msra.mxu1 %v5279_v6  ;;  %3595 = vmatprep.subr.bf16.mxu0 %v5284_v7  ;;  %v5363_v6 = vld [vmem:[#allocation8 + $0x628] ss:$48 sps:$4 sm:$0xff]   ;;  %v5368_v7 = vld [vmem:[#allocation8 + $0x684] ss:$48 sps:$4 sm:$0xff]  }
 0x266   :  { %3677 = vmatprep.subr.bf16.mxu1 %v5287_v8  ;;  %v5371_v8 = vld [vmem:[#allocation8 + $0x68c] ss:$48 sps:$4 sm:$0xff]  }
 0x268   :  { %3596 = vmatpush1.bf16.msra.mxu0 %v5282_v9  ;;  %v5366_v9 = vld [vmem:[#allocation8 + $0x680] ss:$48 sps:$4 sm:$0xff]  }
 0x269   :  { %3678 = vmatpush1.bf16.msra.mxu1 %v5285_v10  ;;  %3597 = vmatprep.subr.bf16.mxu0 %v5290_v11  ;;  %v5369_v10 = vld [vmem:[#allocation8 + $0x688] ss:$48 sps:$4 sm:$0xff]   ;;  %v5374_v11 = vld [vmem:[#allocation8 + $0x6e4] ss:$48 sps:$4 sm:$0xff]  }
 0x26a   :  { %3679 = vmatprep.subr.bf16.mxu1 %v5293_v12  ;;  %v5377_v12 = vld [vmem:[#allocation8 + $0x6ec] ss:$48 sps:$4 sm:$0xff]  }
 0x26c   :  { %3598 = vmatpush1.bf16.msra.mxu0 %v5288_v24  ;;  %v5372_v24 = vld [vmem:[#allocation8 + $0x6e0] ss:$48 sps:$4 sm:$0xff]  }
 0x26d   :  { %3680 = vmatpush1.bf16.msra.mxu1 %v5291_v13  ;;  %3599 = vmatprep.subr.bf16.mxu0 %v5296_v14  ;;  %v5375_v13 = vld [vmem:[#allocation8 + $0x6e8] ss:$48 sps:$4 sm:$0xff]   ;;  %v5380_v14 = vld [vmem:[#allocation8 + $0x744] ss:$48 sps:$4 sm:$0xff]  }
 0x26e   :  { %3681 = vmatprep.subr.bf16.mxu1 %v5299_v15  ;;  %v5378_v15 = vld [vmem:[#allocation8 + $0x740] ss:$48 sps:$4 sm:$0xff]  }
 0x270   :  { %3600 = vmatpush1.bf16.msra.mxu0 %v5294_v16  ;;  %v5381_v16 = vld [vmem:[#allocation8 + $0x748] ss:$48 sps:$4 sm:$0xff]  }
 0x271   :  { %3682 = vmatpush1.bf16.msra.mxu1 %v5297_v17  ;;  %3601 = vmatprep.subr.bf16.mxu0 %v5302_v18  ;;  %v5386_v17 = vld [vmem:[#allocation8 + $0x7a4] ss:$48 sps:$4 sm:$0xff]   ;;  %v5389_v18 = vld [vmem:[#allocation8 + $0x7ac] ss:$48 sps:$4 sm:$0xff]  }
 0x272   :  { %3683 = vmatprep.subr.bf16.mxu1 %v5305_v19  ;;  %v5387_v19 = vld [vmem:[#allocation8 + $0x7a8] ss:$48 sps:$4 sm:$0xff]  }
 0x274   :  { %3602 = vmatpush1.bf16.msra.mxu0 %v5300_v21  ;;  %v5392_v21 = vld [vmem:[#allocation8 + $0x804] ss:$48 sps:$4 sm:$0xff]  }
 0x275   :  { %3684 = vmatpush1.bf16.msra.mxu1 %v5303_v22  ;;  %3603 = vmatprep.subr.bf16.mxu0 %v5308_v23  ;;  %v5395_v22 = vld [vmem:[#allocation8 + $0x80c] ss:$48 sps:$4 sm:$0xff]   ;;  %v5390_v23 = vld [vmem:[#allocation8 + $0x800] ss:$48 sps:$4 sm:$0xff]  }
 0x276   :  { %3685 = vmatprep.subr.bf16.mxu1 %v5311_v1  ;;  %v5393_v1 = vld [vmem:[#allocation8 + $0x808] ss:$48 sps:$4 sm:$0xff]  }
 0x278   :  { %3604 = vmatpush1.bf16.msra.mxu0 %v5306_v25  ;;  %v5398_v25 = vld [vmem:[#allocation8 + $0x864] ss:$48 sps:$4 sm:$0xff]  }
 0x279   :  { %3686 = vmatpush1.bf16.msra.mxu1 %v5309_v26  ;;  %3605 = vmatprep.subr.bf16.mxu0 %v5314_v29 }
 0x27a   :  { %3687 = vmatprep.subr.bf16.mxu1 %v5317_v30  ;;  %v5401_v30 = vld [vmem:[#allocation8 + $0x86c] ss:$48 sps:$4 sm:$0xff]  }
 0x27c   :  { %3606 = vmatpush1.bf16.msra.mxu0 %v5312_v31 }
 0x27d   :  { %3688 = vmatpush1.bf16.msra.mxu1 %v5315_v32  ;;  %3607 = vmatprep.subr.bf16.mxu0 %v5320_v33 }
 0x27e   :  { %3689 = vmatprep.subr.bf16.mxu1 %v5323_v34 }
 0x280   :  { %3608 = vmatpush1.bf16.msra.mxu0 %v5318_v35  ;;  %v5396_v35 = vld [vmem:[#allocation8 + $0x860] ss:$48 sps:$4 sm:$0xff]  }
 0x281   :  { %3690 = vmatpush1.bf16.msra.mxu1 %v5321_v37  ;;  %3609 = vmatprep.subr.bf16.mxu0 %v5326_v38 }
 0x282   :  { %3691 = vmatprep.subr.bf16.mxu1 %v5329_v40  ;;  %v5399_v40 = vld [vmem:[#allocation8 + $0x868] ss:$48 sps:$4 sm:$0xff]  }
 0x284   :  { %3610 = vmatpush1.bf16.msra.mxu0 %v5324_v41  ;;  %v5404_v41 = vld [vmem:[#allocation8 + $0x8c4] ss:$48 sps:$4 sm:$0xff]  }
 0x285   :  { %3692 = vmatpush1.bf16.msra.mxu1 %v5327_v42  ;;  %3611 = vmatprep.subr.bf16.mxu0 %v5332_v20  ;;  %v5407_v42 = vld [vmem:[#allocation8 + $0x8cc] ss:$48 sps:$4 sm:$0xff]   ;;  %v5402_v20 = vld [vmem:[#allocation8 + $0x8c0] ss:$48 sps:$4 sm:$0xff]  }
 0x286   :  { %3693 = vmatprep.subr.bf16.mxu1 %v5335_v43  ;;  %v5405_v43 = vld [vmem:[#allocation8 + $0x8c8] ss:$48 sps:$4 sm:$0xff]  }
 0x288   :  { %3612 = vmatpush1.bf16.msra.mxu0 %v5330_v44  ;;  %v5410_v44 = vld [vmem:[#allocation8 + $0x924] ss:$48 sps:$4 sm:$0xff]  }
 0x289   :  { %3694 = vmatpush1.bf16.msra.mxu1 %v5333_v45  ;;  %3613 = vmatprep.subr.bf16.mxu0 %v5338_v46  ;;  %v5413_v45 = vld [vmem:[#allocation8 + $0x92c] ss:$48 sps:$4 sm:$0xff]   ;;  %v5408_v46 = vld [vmem:[#allocation8 + $0x920] ss:$48 sps:$4 sm:$0xff]  }
 0x28a   :  { %3695 = vmatprep.subr.bf16.mxu1 %v5341_v47  ;;  %v5411_v47 = vld [vmem:[#allocation8 + $0x928] ss:$48 sps:$4 sm:$0xff]  }
 0x28c   :  { %3614 = vmatpush1.bf16.msra.mxu0 %v5336_v48  ;;  %v5416_v48 = vld [vmem:[#allocation8 + $0x984] ss:$48 sps:$4 sm:$0xff]  }
 0x28d   :  { %3696 = vmatpush1.bf16.msra.mxu1 %v5339_v36  ;;  %3615 = vmatprep.subr.bf16.mxu0 %v5344_v49  ;;  %v5419_v36 = vld [vmem:[#allocation8 + $0x98c] ss:$48 sps:$4 sm:$0xff]   ;;  %v5414_v49 = vld [vmem:[#allocation8 + $0x980] ss:$48 sps:$4 sm:$0xff]  }
 0x28e   :  { %3697 = vmatprep.subr.bf16.mxu1 %v5347_v50  ;;  %v5417_v50 = vld [vmem:[#allocation8 + $0x988] ss:$48 sps:$4 sm:$0xff]  }
 0x290   :  { %3616 = vmatpush1.bf16.msra.mxu0 %v5342_v51  ;;  %v5422_v51 = vld [vmem:[#allocation8 + $0x9e4] ss:$48 sps:$4 sm:$0xff]  }
 0x291   :  { %3698 = vmatpush1.bf16.msra.mxu1 %v5345_v52  ;;  %3617 = vmatprep.subr.bf16.mxu0 %v5350_v53  ;;  %v5425_v52 = vld [vmem:[#allocation8 + $0x9ec] ss:$48 sps:$4 sm:$0xff]   ;;  %v5420_v53 = vld [vmem:[#allocation8 + $0x9e0] ss:$48 sps:$4 sm:$0xff]  }
 0x292   :  { %3699 = vmatprep.subr.bf16.mxu1 %v5353_v54  ;;  %v5423_v54 = vld [vmem:[#allocation8 + $0x9e8] ss:$48 sps:$4 sm:$0xff]  }
 0x294   :  { %3618 = vmatpush1.bf16.msra.mxu0 %v5348_v55  ;;  %v5428_v55 = vld [vmem:[#allocation8 + $0xa44] ss:$48 sps:$4 sm:$0xff]  }
 0x295   :  { %3700 = vmatpush1.bf16.msra.mxu1 %v5351_v56  ;;  %3619 = vmatprep.subr.bf16.mxu0 %v5356_v57  ;;  %v5431_v56 = vld [vmem:[#allocation8 + $0xa4c] ss:$48 sps:$4 sm:$0xff]   ;;  %v5426_v57 = vld [vmem:[#allocation8 + $0xa40] ss:$48 sps:$4 sm:$0xff]  }
 0x296   :  { %3701 = vmatprep.subr.bf16.mxu1 %v5359_v58  ;;  %v5429_v58 = vld [vmem:[#allocation8 + $0xa48] ss:$48 sps:$4 sm:$0xff]  }
 0x298   :  { %3620 = vmatpush1.bf16.msra.mxu0 %v5354_v61  ;;  %v5434_v61 = vld [vmem:[#allocation8 + $0xaa4] ss:$48 sps:$4 sm:$0xff]  }
 0x299   :  { %3702 = vmatpush1.bf16.msra.mxu1 %v5357_v2  ;;  %3630 = vmatprep.subr.bf16.mxu0 %v5362_v3  ;;  %v5437_v2 = vld [vmem:[#allocation8 + $0xaac] ss:$48 sps:$4 sm:$0xff]   ;;  %v5432_v3 = vld [vmem:[#allocation8 + $0xaa0] ss:$48 sps:$4 sm:$0xff]  }
 0x29a   :  { %3712 = vmatprep.subr.bf16.mxu1 %v5365_v4  ;;  %v5435_v4 = vld [vmem:[#allocation8 + $0xaa8] ss:$48 sps:$4 sm:$0xff]  }
 0x29b   :  { %3622 = vmatmul.mubr.bf16.vlgmr.msra.gmra.mrb[20].mxu0 %v5747_v27 }
 0x29c   :  { %3704 = vmatmul.mubr.bf16.vlgmr.msra.gmra.mrb[20].mxu1 %v5747_v27  ;;  %3631 = vmatpush1.bf16.msra.mxu0 %v5360_v5  ;;  %v5383_v27 = vld [vmem:[#allocation8 + $0x74c] ss:$48 sps:$4 sm:$0xff]   ;;  %v5440_v5 = vld [vmem:[#allocation8 + $0xb04] ss:$48 sps:$4 sm:$0xff]  }
 0x29d   :  { %3662 = vmatprep.mubr.bf16.mxu0 %v5749_v28  ;;  %3713 = vmatpush1.bf16.msra.mxu1 %v5363_v6  ;;  %v5443_v6 = vld [vmem:[#allocation8 + $0xb0c] ss:$48 sps:$4 sm:$0xff]  }
 0x29e   :  { %3744 = vmatprep.mubr.bf16.mxu1 %v5749_v28  ;;  %3632 = vmatprep.subr.bf16.mxu0 %v5368_v7  ;;  %v5384_v28 = vld [vmem:[#allocation8 + $0x7a0] ss:$48 sps:$4 sm:$0xff]  }
 0x29f   :  { %3714 = vmatprep.subr.bf16.mxu1 %v5371_v8  ;;  %v5438_v7 = vld [vmem:[#allocation8 + $0xb00] ss:$48 sps:$4 sm:$0xff]   ;;  %v5441_v8 = vld [vmem:[#allocation8 + $0xb08] ss:$48 sps:$4 sm:$0xff]  }
 0x2a0   :  { %3633 = vmatpush1.bf16.msra.mxu0 %v5366_v9  ;;  %v5446_v9 = vld [vmem:[#allocation8 + $0xb64] ss:$48 sps:$4 sm:$0xff]  }
 0x2a1   :  { %3715 = vmatpush1.bf16.msra.mxu1 %v5369_v10  ;;  %3634 = vmatprep.subr.bf16.mxu0 %v5374_v11  ;;  %v5449_v10 = vld [vmem:[#allocation8 + $0xb6c] ss:$48 sps:$4 sm:$0xff]   ;;  %v5444_v11 = vld [vmem:[#allocation8 + $0xb60] ss:$48 sps:$4 sm:$0xff]  }
 0x2a2   :  { %3716 = vmatprep.subr.bf16.mxu1 %v5377_v12  ;;  %v5447_v12 = vld [vmem:[#allocation8 + $0xb68] ss:$48 sps:$4 sm:$0xff]  }
 0x2a4   :  { %3635 = vmatpush1.bf16.msra.mxu0 %v5372_v24  ;;  %v5452_v24 = vld [vmem:[#allocation8 + $0xbc4] ss:$48 sps:$4 sm:$0xff]  }
 0x2a5   :  { %3717 = vmatpush1.bf16.msra.mxu1 %v5375_v13  ;;  %3636 = vmatprep.subr.bf16.mxu0 %v5380_v14  ;;  %v5455_v13 = vld [vmem:[#allocation8 + $0xbcc] ss:$48 sps:$4 sm:$0xff]   ;;  %v5450_v14 = vld [vmem:[#allocation8 + $0xbc0] ss:$48 sps:$4 sm:$0xff]  }
 0x2a6   :  { %3718 = vmatprep.subr.bf16.mxu1 %v5383_v27  ;;  %v5453_v27 = vld [vmem:[#allocation8 + $0xbc8] ss:$48 sps:$4 sm:$0xff]  }
 0x2a8   :  { %3637 = vmatpush1.bf16.msra.mxu0 %v5378_v15  ;;  %v5456_v15 = vld [vmem:[%s5902_s5 + $0x40] sm:$0xff]  }
 0x2a9   :  { %3719 = vmatpush1.bf16.msra.mxu1 %v5381_v16  ;;  %3638 = vmatprep.subr.bf16.mxu0 %v5386_v17  ;;  %v5457_v16 = vld [vmem:[%s5902_s5 + $0xc0] sm:$0xff]  }
 0x2aa   :  { %3720 = vmatprep.subr.bf16.mxu1 %v5389_v18  ;;  %v5458_v17 = vld [vmem:[%s5902_s5] sm:$0xff]  }
 0x2ab   :  { %v5459_v18 = vld [vmem:[%s5902_s5 + $0x80] sm:$0xff]  }
 0x2ac   :  { %3639 = vmatpush1.bf16.msra.mxu0 %v5384_v28  ;;  %v5460_v28 = vld [vmem:[%s5902_s5 + $0x48] sm:$0xff]  }
 0x2ad   :  { %3721 = vmatpush1.bf16.msra.mxu1 %v5387_v19  ;;  %3640 = vmatprep.subr.bf16.mxu0 %v5392_v21  ;;  %v5461_v19 = vld [vmem:[%s5902_s5 + $0xc8] sm:$0xff]  }
 0x2ae   :  { %v5776_v26 = vpop.f32.mrb[12].mxu0  ;;  %v5778_v29 = vpop.f32.mrb[12].mxu1  ;;  %3722 = vmatprep.subr.bf16.mxu1 %v5395_v22  ;;  %v5462_v21 = vld [vmem:[%s5902_s5 + $0x8] sm:$0xff]  }
 0x2af   :  { %v5780_v31 = vpop.f32.mrb[13].mxu0  ;;  %v5782_v32 = vpop.f32.mrb[13].mxu1  ;;  %v5463_v22 = vld [vmem:[%s5902_s5 + $0x88] sm:$0xff]  }
 0x2b0   :  { %v3340_v33 = vpop.f32.mrb[14].mxu0  ;;  %v3422_v34 = vpop.f32.mrb[14].mxu1  ;;  %3641 = vmatpush1.bf16.msra.mxu0 %v5390_v23  ;;  %v5464_v23 = vld [vmem:[%s5902_s5 + $0x50] sm:$0xff]  }
 0x2b1   :  { %3723 = vmatpush1.bf16.msra.mxu1 %v5393_v1  ;;  %v3341_v37 = vpop.f32.mrb[15].mxu0  ;;  %v3423_v38 = vpop.f32.mrb[15].mxu1  ;;  %3642 = vmatprep.subr.bf16.mxu0 %v5398_v25  ;;  %v5466_v1 = vld [vmem:[%s5902_s5 + $0x10] sm:$0xff]   ;;  %v5469_v33 = vld [vmem:[%s5902_s5 + $0xd8] sm:$0xff]  }
 0x2b2   :  { %3724 = vmatprep.subr.bf16.mxu1 %v5401_v30  ;;  %v5467_v25 = vld [vmem:[%s5902_s5 + $0x90] sm:$0xff]   ;;  %v5468_v30 = vld [vmem:[%s5902_s5 + $0x58] sm:$0xff]   ;;  %v5472_v37 = vld [vmem:[%s5902_s5 + $0x60] sm:$0xff]  }
 0x2b3   :  { %v5470_v34 = vld [vmem:[%s5902_s5 + $0x18] sm:$0xff]   ;;  %v5473_v38 = vld [vmem:[%s5902_s5 + $0xe0] sm:$0xff]  }
 0x2b4   :  { %3643 = vmatpush1.bf16.msra.mxu0 %v5396_v35  ;;  %v5471_v35 = vld [vmem:[%s5902_s5 + $0x98] sm:$0xff]  }
 0x2b5   :  { %3725 = vmatpush1.bf16.msra.mxu1 %v5399_v40  ;;  %3644 = vmatprep.subr.bf16.mxu0 %v5404_v41  ;;  %v5474_v40 = vld [vmem:[%s5902_s5 + $0x20] sm:$0xff]  }
 0x2b6   :  { %3726 = vmatprep.subr.bf16.mxu1 %v5407_v42  ;;  %v5475_v41 = vld [vmem:[%s5902_s5 + $0xa0] sm:$0xff]   ;;  %v5476_v42 = vld [vmem:[%s5902_s5 + $0x68] sm:$0xff]  }
 0x2b8   :  { %3645 = vmatpush1.bf16.msra.mxu0 %v5402_v20  ;;  %v5477_v20 = vld [vmem:[%s5902_s5 + $0xe8] sm:$0xff]  }
 0x2b9   :  { %3727 = vmatpush1.bf16.msra.mxu1 %v5405_v43  ;;  %3646 = vmatprep.subr.bf16.mxu0 %v5410_v44  ;;  %v5478_v44 = vld [vmem:[%s5902_s5 + $0x28] sm:$0xff]  }
 0x2ba   :  { %3728 = vmatprep.subr.bf16.mxu1 %v5413_v45  ;;  %v5479_v45 = vld [vmem:[%s5902_s5 + $0xa8] sm:$0xff]  }
 0x2bc   :  { %3647 = vmatpush1.bf16.msra.mxu0 %v5408_v46 }
 0x2bd   :  { %3729 = vmatpush1.bf16.msra.mxu1 %v5411_v47  ;;  %3648 = vmatprep.subr.bf16.mxu0 %v5416_v48 }
 0x2be   :  { %3730 = vmatprep.subr.bf16.mxu1 %v5419_v36 }
 0x2c0   :  { %3649 = vmatpush1.bf16.msra.mxu0 %v5414_v49 }
 0x2c1   :  { %3731 = vmatpush1.bf16.msra.mxu1 %v5417_v50  ;;  %3650 = vmatprep.subr.bf16.mxu0 %v5422_v51 }
 0x2c2   :  { %3732 = vmatprep.subr.bf16.mxu1 %v5425_v52 }
 0x2c4   :  { %3651 = vmatpush1.bf16.msra.mxu0 %v5420_v53 }
 0x2c5   :  { %3733 = vmatpush1.bf16.msra.mxu1 %v5423_v54  ;;  %3652 = vmatprep.subr.bf16.mxu0 %v5428_v55  ;;  %v5480_v55 = vld [vmem:[%s5902_s5 + $0x70] sm:$0xff]  }
 0x2c6   :  { %3734 = vmatprep.subr.bf16.mxu1 %v5431_v56 }
 0x2c8   :  { %3653 = vmatpush1.bf16.msra.mxu0 %v5426_v57  ;;  %v5485_v57 = vld [vmem:[%s5902_s5 + $0xf8] sm:$0xff]  }
 0x2c9   :  { %3735 = vmatpush1.bf16.msra.mxu1 %v5429_v58  ;;  %3654 = vmatprep.subr.bf16.mxu0 %v5434_v61  ;;  %v5486_v58 = vld [vmem:[%s5902_s5 + $0x38] sm:$0xff]  }
 0x2ca   :  { %3736 = vmatprep.subr.bf16.mxu1 %v5437_v2  ;;  %v5487_v61 = vld [vmem:[%s5902_s5 + $0xb8] sm:$0xff]   ;;  %v3761_v2 = vld [vmem:[#allocation10] sm:$0xf] }
 0x2cc   :  { %3655 = vmatpush1.bf16.msra.mxu0 %v5432_v3  ;;  %v3766_v3 = vrot.slane %v3761_v2, %v927_v60 }
 0x2cd   :  { %3737 = vmatpush1.bf16.msra.mxu1 %v5435_v4  ;;  %3656 = vmatprep.subr.bf16.mxu0 %v5440_v5  ;;  %v3774_v5 = vrot.slane %v3761_v2, %v935_v63 }
 0x2ce   :  { %3738 = vmatprep.subr.bf16.mxu1 %v5443_v6  ;;  %v3770_v6 = vrot.slane %v3761_v2, %v931_v62 }
 0x2d0   :  { %3657 = vmatpush1.bf16.msra.mxu0 %v5438_v7 }
 0x2d1   :  { %3739 = vmatpush1.bf16.msra.mxu1 %v5441_v8  ;;  %3658 = vmatprep.subr.bf16.mxu0 %v5446_v9 }
 0x2d2   :  { %3740 = vmatprep.subr.bf16.mxu1 %v5449_v10  ;;  %v3778_v10 = vrot.slane %v3761_v2, %v939_v0 }
 0x2d4   :  { %3659 = vmatpush1.bf16.msra.mxu0 %v5444_v11 }
 0x2d5   :  { %3741 = vmatpush1.bf16.msra.mxu1 %v5447_v12  ;;  %3660 = vmatprep.subr.bf16.mxu0 %v5452_v24 }
 0x2d6   :  { %3742 = vmatprep.subr.bf16.mxu1 %v5455_v13 }
 0x2d8   :  { %3661 = vmatpush1.bf16.msra.mxu0 %v5450_v14 }
 0x2d9   :  { %3743 = vmatpush1.bf16.msra.mxu1 %v5453_v27  ;;  %4660 = vmatprep.subr.bf16.mxu0 %v5456_v15 }
 0x2da   :  { %4682 = vmatprep.subr.bf16.mxu1 %v5457_v16 }
 0x2db   :  { %3663 = vmatmul.mubr.bf16.vlgmr.msra.gmra.mrb[20].mxu0 %v5758_v39 }
 0x2dc   :  { %3745 = vmatmul.mubr.bf16.vlgmr.msra.gmra.mrb[20].mxu1 %v5758_v39  ;;  %4661 = vmatpush3.bf16.msra.mxu0 %v5458_v17  ;;  %v5465_v39 = vld [vmem:[%s5902_s5 + $0xd0] sm:$0xff]  }
 0x2dd   :  { %4683 = vmatpush3.bf16.msra.mxu1 %v5459_v18  ;;  %4662 = vmatprep.subr.bf16.mxu0 %v5460_v28 }
 0x2de   :  { %4684 = vmatprep.subr.bf16.mxu1 %v5461_v19 }
 0x2e0   :  { %4663 = vmatpush3.bf16.msra.mxu0 %v5462_v21 }
 0x2e1   :  { %4685 = vmatpush3.bf16.msra.mxu1 %v5463_v22  ;;  %4664 = vmatprep.subr.bf16.mxu0 %v5464_v23 }
 0x2e2   :  { %4686 = vmatprep.subr.bf16.mxu1 %v5465_v39 }
 0x2e4   :  { %4665 = vmatpush3.bf16.msra.mxu0 %v5466_v1 }
 0x2e5   :  { %4687 = vmatpush3.bf16.msra.mxu1 %v5467_v25  ;;  %4666 = vmatprep.subr.bf16.mxu0 %v5468_v30  ;;  %v4627_v25 = vld [vmem:[#allocation2] ss:$0 sm:$0xff] }
 0x2e6   :  { %4688 = vmatprep.subr.bf16.mxu1 %v5469_v33 }
 0x2e8   :  { %4667 = vmatpush3.bf16.msra.mxu0 %v5470_v34 }
 0x2e9   :  { %4689 = vmatpush3.bf16.msra.mxu1 %v5471_v35  ;;  %4668 = vmatprep.subr.bf16.mxu0 %v5472_v37 }
 0x2ea   :  { %4690 = vmatprep.subr.bf16.mxu1 %v5473_v38 }
 0x2ec   :  { %4669 = vmatpush3.bf16.msra.mxu0 %v5474_v40 }
 0x2ed   :  { %4691 = vmatpush3.bf16.msra.mxu1 %v5475_v41  ;;  %4670 = vmatprep.subr.bf16.mxu0 %v5476_v42 }
 0x2ee   :  { %4692 = vmatprep.subr.bf16.mxu1 %v5477_v20 }
 0x2f0   :  { %4671 = vmatpush3.bf16.msra.mxu0 %v5478_v44 }
 0x2f1   :  { %4693 = vmatpush3.bf16.msra.mxu1 %v5479_v45  ;;  %4672 = vmatprep.subr.bf16.mxu0 %v5480_v55 }
 0x32e   :  { %v3500_v43 = vpop.f32.mrb[16].mxu0 }
 0x32f   :  { %v3753_v46 = vmax.f32 %v5776_v26, %v3500_v43  ;;  %v3582_v47 = vpop.f32.mrb[16].mxu1  ;;  %v3502_v48 = vpop.f32.mrb[17].mxu0  ;;  %v5481_v26 = vld [vmem:[%s5902_s5 + $0xf0] sm:$0xff]  }
 0x330   :  { %v3755_v36 = vmax.f32 %v5778_v29, %v3582_v47  ;;  %v3754_v49 = vmax.f32 %v5780_v31, %v3502_v48  ;;  %v3584_v50 = vpop.f32.mrb[17].mxu1  ;;  %v3504_v51 = vpop.f32.mrb[18].mxu0  ;;  %v5482_v29 = vld [vmem:[%s5902_s5 + $0x30] sm:$0xff]   ;;  %4694 = vmatprep.subr.bf16.mxu1 %v5481_v26 }
 0x331   :  { %v3756_v52 = vmax.f32 %v5782_v32, %v3584_v50  ;;  %v3586_v53 = vpop.f32.mrb[18].mxu1  ;;  %v3505_v54 = vpop.f32.mrb[19].mxu0  ;;  %v5483_v31 = vld [vmem:[%s5902_s5 + $0xb0] sm:$0xff]   ;;  %4673 = vmatpush3.bf16.msra.mxu0 %v5482_v29  ;;  %v5484_v32 = vld [vmem:[%s5902_s5 + $0x78] sm:$0xff]  }
 0x332   :  { %v3587_v56 = vpop.f32.mrb[19].mxu1  ;;  %4695 = vmatpush3.bf16.msra.mxu1 %v5483_v31  ;;  %4674 = vmatprep.subr.bf16.mxu0 %v5484_v32 }
 0x333   :  { %4696 = vmatprep.subr.bf16.mxu1 %v5485_v57 }
 0x335   :  { %4675 = vmatpush3.bf16.msra.mxu0 %v5486_v58 }
 0x336   :  { %4697 = vmatpush3.bf16.msra.mxu1 %v5487_v61 }
 0x3ae   :  { %v3664_v4 = vpop.f32.mrb[20].mxu0 }
 0x3af   :  { %v3757_v7 = vmax.f32 %v3753_v46, %v3664_v4  ;;  %v3746_v8 = vpop.f32.mrb[20].mxu1  ;;  %v3666_v9 = vpop.f32.mrb[21].mxu0 }
 0x3b0   :  { %v3759_v11 = vmax.f32 %v3755_v36, %v3746_v8  ;;  %v3758_v12 = vmax.f32 %v3754_v49, %v3666_v9  ;;  %v3748_v24 = vpop.f32.mrb[21].mxu1  ;;  %v3668_v13 = vpop.f32.mrb[22].mxu0 }
 0x3b1   :  { %v3783_v14 = vadd.f32 %v3766_v3, %v3757_v7  ;;  %v3760_v27 = vmax.f32 %v3756_v52, %v3748_v24  ;;  %v3750_v60 = vpop.f32.mrb[22].mxu1  ;;  %v3669_v15 = vpop.f32.mrb[23].mxu0 }
 0x3b2   :  { %v3785_v16 = vadd.f32 %v3774_v5, %v3759_v11  ;;  %v3784_v17 = vadd.f32 %v3770_v6, %v3758_v12  ;;  %v3751_v63 = vpop.f32.mrb[23].mxu1 }
 0x3b3   :  { %v3787_v18 = vmax.f32 %v3783_v14, 0.0  ;;  %v3786_v28 = vadd.f32 %v3778_v10, %v3760_v27 }
 0x3b4   :  { %v3789_v62 = vmax.f32 %v3785_v16, 0.0  ;;  %v3788_v19 = vmax.f32 %v3784_v17, 0.0 }
 0x3b5   :  { %v3790_v21 = vmax.f32 %v3786_v28, 0.0  ;;  %v3791_v23 = vpack.c.bf16 %v3787_v18, %v3787_v18 }
 0x3b6   :  { %v3792_v22 = vpack.c.bf16 %v3788_v19, %v3788_v19  ;;  %v3793_v0 = vpack.c.bf16 %v3789_v62, %v3789_v62 }
 0x3b7   :  { %v3794_v59 = vpack.c.bf16 %v3790_v21, %v3790_v21 }
 0x3b8   :  { %4090 = vmatprep.mubr.bf16.mxu0 %v3792_v22 }
 0x3b9   :  { %4130 = vmatprep.mubr.bf16.mxu1 %v3794_v59  ;;  %4091 = vmatmul.mubr.bf16.vlgmr.msra.gmra.mrb[24].mxu0 %v3791_v23 }
 0x3ba   :  { %4131 = vmatmul.mubr.bf16.vlgmr.msra.gmra.mrb[24].mxu1 %v3793_v0 }
 0x48c   :  { %v4676_v39 = vpop.f32.mrb[24].mxu0 }
 0x48d   :  { %v4698_v1 = vpop.f32.mrb[24].mxu1  ;;  %v4677_v30 = vpop.f32.mrb[25].mxu0 }
 0x48e   :  { %v4678_v33 = vadd.f32 %v4677_v30, %v4676_v39  ;;  %v4699_v34 = vpop.f32.mrb[25].mxu1  ;;  %v4679_v35 = vpop.f32.mrb[26].mxu0 }
 0x48f   :  { %v4700_v37 = vadd.f32 %v4699_v34, %v4698_v1  ;;  %v4701_v38 = vpop.f32.mrb[26].mxu1  ;;  %v4680_v40 = vpop.f32.mrb[27].mxu0 }
 0x490   :  { %v4093_v41 = vadd.f32 %v4678_v33, %v4627_v25  ;;  %v4702_v42 = vpop.f32.mrb[27].mxu1 }
 0x492   :  { %v4133_v20 = vadd.f32 %v4700_v37, %v4093_v41 }
 0x494   :  { %4139 = vst.msk [vmem:[%s5904_s7] sm:$0xff] %vm4138_vm0, %v4133_v20 }
 0x495   :  { %4144 = vsyncpa [#allocation4], 1 }
 0x496   :  { %4145 = vsyncpa [#allocation6], 1 }
 0x497   :  { %4146 = vsyncpa [#allocation9], 1 }

</bundles_post_ra>
